<compile_context>
chip_gen: v7x
topology: tpu7x:2x2x1
jax: 0.10.0
libtpu: 0.0.40
codegen_flags: <defaults>
</compile_context>

<pallas_src>
import functools
import math

import jax
import jax.numpy as jnp
import numpy as np
from jax.experimental import pallas as pl
from jax.experimental.pallas import tpu as pltpu

_EPS = 1e-5
_PREC = jax.lax.Precision.HIGHEST  # reference only


def _bn_train(h, gamma, beta):
    """BatchNorm1d training-mode forward on a (C, B*T) f32 slab (one-pass stats)."""
    inv_n = 1.0 / h.shape[1]
    s1 = jnp.sum(h, axis=1, keepdims=True)
    s2 = jnp.sum(h * h, axis=1, keepdims=True)
    m = s1 * inv_n
    v = s2 * inv_n - m * m
    scale = gamma * jax.lax.rsqrt(v + _EPS)
    return h * scale + (beta - m * scale)


def _bottle2neck_kernel(
    x_ref, w1_ref, b1_ref, g1_ref, be1_ref,
    wc_ref, bc_ref, gc_ref, bec_ref,
    w3_ref, b3_ref, g3_ref, be3_ref,
    wr_ref, wfc_ref, bfc_ref, alpha_ref,
    mask_ref, avg_ref, expand_ref,
    out_ref,
    *, width, scale, ksize, dil, pad):
    f32 = jnp.float32
    bf16 = jnp.bfloat16
    nums = scale - 1
    BT = out_ref.shape[1]

    x = x_ref[...]                                                # bf16 (Cin, BT)

    # ---- conv1 (1x1) + ReLU + BN1 ---------------------------------------
    h = jnp.dot(w1_ref[...], x, preferred_element_type=f32) + b1_ref[...]
    h = jnp.maximum(h, 0.0)
    h = _bn_train(h, g1_ref[...], be1_ref[...])                   # f32 (width*scale, BT)

    # ---- conv3 accumulator, seeded with the pass-through last chunk -----
    o_acc = jnp.dot(w3_ref[nums],
                    h[nums * width:scale * width].astype(bf16),
                    preferred_element_type=f32)                   # f32 (planes, BT)

    # ---- Res2Net hierarchical branches (all batches fused per matmul) ----
    sp = None
    for i in range(nums):
        chunk = h[i * width:(i + 1) * width, :]
        sp = chunk if i == 0 else sp + chunk

        # im2col slab: tap j reads sp shifted by (j*dil - pad) within each batch,
        # realized as a lane roll (XLU) + zero mask at the batch edges.
        taps = []
        for j in range(ksize):
            s = j * dil - pad
            if s == 0:
                taps.append(sp)
            else:
                rolled = pltpu.roll(sp, shift=(-s) % BT, axis=1)
                taps.append(rolled * mask_ref[j])
        col = jnp.concatenate(taps, axis=0).astype(bf16)          # (ksize*width, BT)

        conv = jnp.dot(wc_ref[i], col, preferred_element_type=f32) + bc_ref[i]
        conv = jnp.maximum(conv, 0.0)                             # ReLU
        sp = _bn_train(conv, gc_ref[i], bec_ref[i])               # f32 (width, BT)

        # fold this branch straight into conv3 (no cat scratch)
        o_acc = o_acc + jnp.dot(w3_ref[i], sp.astype(bf16),
                                preferred_element_type=f32)

    # ---- conv3 bias + ReLU + BN3 ----------------------------------------
    o = jnp.maximum(o_acc + b3_ref[...], 0.0)
    o = _bn_train(o, g3_ref[...], be3_ref[...])                   # f32 (planes, BT)

    # ---- residual (1x1 conv, no bias; inplanes != planes here) ----------
    z = o + jnp.dot(wr_ref[...], x, preferred_element_type=f32)
    # TODO(synk): MaxPool1d branch not implemented (module constructed with pool=False).

    # ---- AFMS (batched over B): out = (z + alpha) * sigmoid(FC(mean_T(z)))
    m = jnp.dot(z.astype(bf16), avg_ref[...],
                preferred_element_type=f32)                       # (planes, B)
    y = jax.nn.sigmoid(jnp.dot(wfc_ref[...], m.astype(bf16),
                               preferred_element_type=f32) + bfc_ref[...])
    ybt = jnp.dot(y.astype(bf16), expand_ref[...],
                  preferred_element_type=f32)                     # (planes, BT)
    out_ref[...] = (z + alpha_ref[...]) * ybt                     # single lane-dense store


def bottle2neck(x, params, *, planes, scale, ksize, dil):
    B, Cin, T = x.shape
    assert planes % scale == 0, "planes must be divisible by scale"
    width = planes // scale
    nums = scale - 1
    pad = (ksize // 2) * dil
    BT = B * T
    assert width % 8 == 0, "width must be sublane (8) aligned"
    assert BT % 128 == 0, "B*T must be lane (128) aligned"
    # TODO(synk): for production RawNet3 sizes, tile the B*T axis with a grid + a
    # two-pass BN (stats pass then normalize pass) so the kernel fits v7x VMEM and
    # gets a "parallel" axis across both TensorCores.

    f32, bf16 = jnp.float32, jnp.bfloat16
    x2d = jnp.transpose(x, (1, 0, 2)).reshape(Cin, BT).astype(bf16)

    # conv weights flattened for the per-branch im2col matmul: (nums, width, ksize*width)
    wc_flat = jnp.transpose(params["wc"], (0, 2, 1, 3)).reshape(
        nums, width, ksize * width).astype(bf16)
    # conv3 weight split per input chunk: (scale, planes, width)
    w3_split = jnp.transpose(params["w3"].reshape(planes, scale, width),
                             (1, 0, 2)).astype(bf16)

    # tap validity masks (zero padding at batch edges): mask[j, 0, n] = 1 iff the
    # input index (n % T) + j*dil - pad is inside [0, T).
    t = np.arange(BT) % T
    shifts = np.arange(ksize) * dil - pad
    mask_np = ((t[None, :] + shifts[:, None] >= 0)
               & (t[None, :] + shifts[:, None] < T)).astype(np.float32)
    mask = jnp.asarray(mask_np.reshape(ksize, 1, BT), f32)

    # AFMS helpers: per-batch averaging (BT, B) and broadcast-back (B, BT) matrices.
    batch_of = np.arange(BT) // T
    avg_np = (batch_of[:, None] == np.arange(B)[None, :]).astype(np.float32) / T
    exp_np = (np.arange(B)[:, None] == batch_of[None, :]).astype(np.float32)
    avg = jnp.asarray(avg_np, bf16)
    expand = jnp.asarray(exp_np, bf16)

    kern = functools.partial(_bottle2neck_kernel, width=width, scale=scale,
                             ksize=ksize, dil=dil, pad=pad)
    vmem = pl.BlockSpec(memory_space=pltpu.MemorySpace.VMEM)
    args = (x2d,
            params["w1"].astype(bf16), params["b1"], params["g1"], params["be1"],
            wc_flat, params["bc"], params["gc"], params["bec"],
            w3_split, params["b3"], params["g3"], params["be3"],
            params["wr"].astype(bf16), params["wfc"].astype(bf16),
            params["bfc"], params["alpha"],
            mask, avg, expand)

    out2d = pl.pallas_call(
        kern,
        out_shape=jax.ShapeDtypeStruct((planes, BT), f32),
        in_specs=[vmem] * len(args),
        out_specs=vmem,
        compiler_params=pltpu.CompilerParams(vmem_limit_bytes=32 * 1024 * 1024),
    )(*args)
    return out2d.reshape(planes, B, T).transpose(1, 0, 2)          # back to (B, planes, T)


def make_params(key, inplanes, planes, scale, ksize):
    width = planes // scale
    nums = scale - 1
    ks = jax.random.split(key, 15)
    rnd = lambda k, shape, s=0.1: jax.random.normal(k, shape, jnp.float32) * s
    return dict(
        w1=rnd(ks[0], (width * scale, inplanes)),
        b1=rnd(ks[1], (width * scale, 1)),
        g1=1.0 + rnd(ks[2], (width * scale, 1)),
        be1=rnd(ks[3], (width * scale, 1)),
        # conv weights stored as (branch, tap, out_ch, in_ch)
        wc=rnd(ks[4], (nums, ksize, width, width)),
        bc=rnd(ks[5], (nums, width, 1)),
        gc=1.0 + rnd(ks[6], (nums, width, 1)),
        bec=rnd(ks[7], (nums, width, 1)),
        w3=rnd(ks[8], (planes, width * scale)),
        b3=rnd(ks[9], (planes, 1)),
        g3=1.0 + rnd(ks[10], (planes, 1)),
        be3=rnd(ks[11], (planes, 1)),
        wr=rnd(ks[12], (planes, inplanes)),
        wfc=rnd(ks[13], (planes, planes)),
        bfc=rnd(ks[14], (planes, 1)),
        alpha=jnp.ones((planes, 1), jnp.float32),                  # torch.ones init
    )


def reference(x, params, *, planes, scale, ksize, dil):
    """Pure-JAX f32 HIGHEST mirror of the PyTorch forward (training-mode BN)."""
    B, Cin, T = x.shape
    width = planes // scale
    nums = scale - 1
    pad = (ksize // 2) * dil
    x2d = jnp.transpose(x, (1, 0, 2)).reshape(Cin, B * T)
    dot = functools.partial(jnp.dot, precision=_PREC)

    def bn(h, g, b):
        m = h.mean(axis=1, keepdims=True)
        v = ((h - m) ** 2).mean(axis=1, keepdims=True)
        return g * (h - m) / jnp.sqrt(v + _EPS) + b

    h = jnp.maximum(dot(params["w1"], x2d) + params["b1"], 0.0)
    h = bn(h, params["g1"], params["be1"])
    outs, sp = [], None
    for i in range(nums):
        chunk = h[i * width:(i + 1) * width]
        sp = chunk if i == 0 else sp + chunk
        sp3 = sp.reshape(width, B, T)
        spp = jnp.pad(sp3, ((0, 0), (0, 0), (pad, pad)))
        acc = jnp.zeros((width, B, T), jnp.float32)
        for j in range(ksize):
            acc = acc + jnp.einsum('oc,cbt->obt', params["wc"][i, j],
                                   spp[:, :, j * dil:j * dil + T], precision=_PREC)
        cv = jnp.maximum(acc.reshape(width, B * T) + params["bc"][i], 0.0)
        sp = bn(cv, params["gc"][i], params["bec"][i])
        outs.append(sp)
    outs.append(h[nums * width:scale * width])
    cat = jnp.concatenate(outs, axis=0)
    o = jnp.maximum(dot(params["w3"], cat) + params["b3"], 0.0)
    o = bn(o, params["g3"], params["be3"])
    z = o + dot(params["wr"], x2d)
    z3 = z.reshape(planes, B, T)
    m = z3.mean(axis=2)                                            # (planes, B)
    y = jax.nn.sigmoid(jnp.einsum('oi,ib->ob', params["wfc"], m, precision=_PREC)
                       + params["bfc"])
    out3 = (z3 + params["alpha"][:, None, :]) * y[:, :, None]
    return out3.transpose(1, 0, 2)


if __name__ == "__main__":
    B, Cin, T = 2, 16, 64
    planes, scale, ksize, dil = 32, 4, 3, 2

    key = jax.random.PRNGKey(0)
    kx, kp = jax.random.split(key)
    x = jax.random.normal(kx, (B, Cin, T), jnp.float32)
    params = make_params(kp, Cin, planes, scale, ksize)

    out = bottle2neck(x, params, planes=planes, scale=scale, ksize=ksize, dil=dil)
    out = jax.block_until_ready(out)
    assert out.shape == (B, planes, T)

    ref = reference(x, params, planes=planes, scale=scale, ksize=ksize, dil=dil)
    # Tolerance accounts for bf16 MXU operands (f32 accumulation) vs f32 HIGHEST reference.
    np.testing.assert_allclose(np.asarray(out), np.asarray(ref), rtol=5e-2, atol=5e-2)
    print("KERNEL_OK")
</pallas_src>

<mosaic_0001>
module attributes {stable_mosaic.version = 11 : i64} {
  func.func @_bottle2neck_kernel(%arg0: memref<16x128xbf16, #tpu.memory_space<vmem>>, %arg1: memref<32x16xbf16, #tpu.memory_space<vmem>>, %arg2: memref<32x1xf32, #tpu.memory_space<vmem>>, %arg3: memref<32x1xf32, #tpu.memory_space<vmem>>, %arg4: memref<32x1xf32, #tpu.memory_space<vmem>>, %arg5: memref<3x8x24xbf16, #tpu.memory_space<vmem>>, %arg6: memref<3x8x1xf32, #tpu.memory_space<vmem>>, %arg7: memref<3x8x1xf32, #tpu.memory_space<vmem>>, %arg8: memref<3x8x1xf32, #tpu.memory_space<vmem>>, %arg9: memref<4x32x8xbf16, #tpu.memory_space<vmem>>, %arg10: memref<32x1xf32, #tpu.memory_space<vmem>>, %arg11: memref<32x1xf32, #tpu.memory_space<vmem>>, %arg12: memref<32x1xf32, #tpu.memory_space<vmem>>, %arg13: memref<32x16xbf16, #tpu.memory_space<vmem>>, %arg14: memref<32x32xbf16, #tpu.memory_space<vmem>>, %arg15: memref<32x1xf32, #tpu.memory_space<vmem>>, %arg16: memref<32x1xf32, #tpu.memory_space<vmem>>, %arg17: memref<3x1x128xf32, #tpu.memory_space<vmem>>, %arg18: memref<128x2xbf16, #tpu.memory_space<vmem>>, %arg19: memref<2x128xbf16, #tpu.memory_space<vmem>>, %arg20: memref<32x128xf32, #tpu.memory_space<vmem>>) attributes {dimension_semantics = [], scalar_prefetch = 0 : i64, scratch_operands = 0 : i64, tpu.core_type = #tpu.core_type<tc>} {
    %c0 = arith.constant 0 : index
    %c0_0 = arith.constant 0 : index
    %0 = vector.load %arg0[%c0, %c0_0] : memref<16x128xbf16, #tpu.memory_space<vmem>>, vector<16x128xbf16>
    %c0_1 = arith.constant 0 : index
    %c0_2 = arith.constant 0 : index
    %1 = vector.load %arg1[%c0_1, %c0_2] : memref<32x16xbf16, #tpu.memory_space<vmem>>, vector<32x16xbf16>
    %cst = arith.constant dense<0.000000e+00> : vector<32x128xf32>
    %2 = tpu.matmul %1, %0, %cst {dimension_numbers = #tpu.dot_dimension_numbers<[1], [0], [0], [1], [0, 0, 1, 1], [], []>} : vector<32x16xbf16>, vector<16x128xbf16>, vector<32x128xf32> -> vector<32x128xf32>
    %c0_3 = arith.constant 0 : index
    %c0_4 = arith.constant 0 : index
    %3 = vector.load %arg2[%c0_3, %c0_4] : memref<32x1xf32, #tpu.memory_space<vmem>>, vector<32x1xf32>
    %4 = vector.broadcast %3 : vector<32x1xf32> to vector<32x128xf32>
    %5 = arith.addf %2, %4 : vector<32x128xf32>
    %cst_5 = arith.constant 0.000000e+00 : f32
    %6 = vector.broadcast %cst_5 : f32 to vector<32x128xf32>
    %7 = arith.maximumf %5, %6 : vector<32x128xf32>
    %c0_6 = arith.constant 0 : index
    %c0_7 = arith.constant 0 : index
    %8 = vector.load %arg3[%c0_6, %c0_7] : memref<32x1xf32, #tpu.memory_space<vmem>>, vector<32x1xf32>
    %c0_8 = arith.constant 0 : index
    %c0_9 = arith.constant 0 : index
    %9 = vector.load %arg4[%c0_8, %c0_9] : memref<32x1xf32, #tpu.memory_space<vmem>>, vector<32x1xf32>
    %cst_10 = arith.constant dense<0.000000e+00> : vector<32xf32>
    %10 = vector.multi_reduction <add>, %7, %cst_10 [1] : vector<32x128xf32> to vector<32xf32>
    %11 = vector.shape_cast %10 : vector<32xf32> to vector<32x1xf32>
    %12 = arith.mulf %7, %7 : vector<32x128xf32>
    %cst_11 = arith.constant dense<0.000000e+00> : vector<32xf32>
    %13 = vector.multi_reduction <add>, %12, %cst_11 [1] : vector<32x128xf32> to vector<32xf32>
    %14 = vector.shape_cast %13 : vector<32xf32> to vector<32x1xf32>
    %cst_12 = arith.constant 7.812500e-03 : f32
    %15 = vector.broadcast %cst_12 : f32 to vector<32x1xf32>
    %16 = arith.mulf %11, %15 : vector<32x1xf32>
    %cst_13 = arith.constant 7.812500e-03 : f32
    %17 = vector.broadcast %cst_13 : f32 to vector<32x1xf32>
    %18 = arith.mulf %14, %17 : vector<32x1xf32>
    %19 = arith.mulf %16, %16 : vector<32x1xf32>
    %20 = arith.subf %18, %19 : vector<32x1xf32>
    %cst_14 = arith.constant 9.99999974E-6 : f32
    %21 = vector.broadcast %cst_14 : f32 to vector<32x1xf32>
    %22 = arith.addf %20, %21 : vector<32x1xf32>
    %23 = math.rsqrt %22 : vector<32x1xf32>
    %24 = arith.mulf %8, %23 : vector<32x1xf32>
    %25 = vector.broadcast %24 : vector<32x1xf32> to vector<32x128xf32>
    %26 = arith.mulf %7, %25 : vector<32x128xf32>
    %27 = arith.mulf %16, %24 : vector<32x1xf32>
    %28 = arith.subf %9, %27 : vector<32x1xf32>
    %29 = vector.broadcast %28 : vector<32x1xf32> to vector<32x128xf32>
    %30 = arith.addf %26, %29 : vector<32x128xf32>
    %c3 = arith.constant 3 : index
    %c0_15 = arith.constant 0 : index
    %c0_16 = arith.constant 0 : index
    %31 = vector.load %arg9[%c3, %c0_15, %c0_16] : memref<4x32x8xbf16, #tpu.memory_space<vmem>>, vector<1x32x8xbf16>
    %32 = vector.shape_cast %31 : vector<1x32x8xbf16> to vector<32x8xbf16>
    %33 = vector.extract_strided_slice %30 {offsets = [24, 0], sizes = [8, 128], strides = [1, 1]} : vector<32x128xf32> to vector<8x128xf32>
    %34 = arith.truncf %33 : vector<8x128xf32> to vector<8x128xbf16>
    %cst_17 = arith.constant dense<0.000000e+00> : vector<32x128xf32>
    %35 = tpu.matmul %32, %34, %cst_17 {dimension_numbers = #tpu.dot_dimension_numbers<[1], [0], [0], [1], [0, 0, 1, 1], [], []>} : vector<32x8xbf16>, vector<8x128xbf16>, vector<32x128xf32> -> vector<32x128xf32>
    %36 = vector.extract_strided_slice %30 {offsets = [0, 0], sizes = [8, 128], strides = [1, 1]} : vector<32x128xf32> to vector<8x128xf32>
    %c2_i32 = arith.constant 2 : i32
    %37 = tpu.dynamic_rotate %36 by %c2_i32 dim 1 : vector<8x128xf32>, i32 -> vector<8x128xf32>
    %c0_18 = arith.constant 0 : index
    %c0_19 = arith.constant 0 : index
    %c0_20 = arith.constant 0 : index
    %38 = vector.load %arg17[%c0_18, %c0_19, %c0_20] : memref<3x1x128xf32, #tpu.memory_space<vmem>>, vector<1x1x128xf32>
    %39 = vector.shape_cast %38 : vector<1x1x128xf32> to vector<1x128xf32>
    %40 = vector.broadcast %39 : vector<1x128xf32> to vector<8x128xf32>
    %41 = arith.mulf %37, %40 : vector<8x128xf32>
    %c126_i32 = arith.constant 126 : i32
    %42 = tpu.dynamic_rotate %36 by %c126_i32 dim 1 : vector<8x128xf32>, i32 -> vector<8x128xf32>
    %c2 = arith.constant 2 : index
    %c0_21 = arith.constant 0 : index
    %c0_22 = arith.constant 0 : index
    %43 = vector.load %arg17[%c2, %c0_21, %c0_22] : memref<3x1x128xf32, #tpu.memory_space<vmem>>, vector<1x1x128xf32>
    %44 = vector.shape_cast %43 : vector<1x1x128xf32> to vector<1x128xf32>
    %45 = vector.broadcast %44 : vector<1x128xf32> to vector<8x128xf32>
    %46 = arith.mulf %42, %45 : vector<8x128xf32>
    %47 = tpu.concatenate %41, %36, %46 in 0 : vector<8x128xf32>, vector<8x128xf32>, vector<8x128xf32> -> vector<24x128xf32>
    %48 = arith.truncf %47 : vector<24x128xf32> to vector<24x128xbf16>
    %c0_23 = arith.constant 0 : index
    %c0_24 = arith.constant 0 : index
    %c0_25 = arith.constant 0 : index
    %49 = vector.load %arg5[%c0_23, %c0_24, %c0_25] : memref<3x8x24xbf16, #tpu.memory_space<vmem>>, vector<1x8x24xbf16>
    %50 = vector.shape_cast %49 : vector<1x8x24xbf16> to vector<8x24xbf16>
    %cst_26 = arith.constant dense<0.000000e+00> : vector<8x128xf32>
    %51 = tpu.matmul %50, %48, %cst_26 {dimension_numbers = #tpu.dot_dimension_numbers<[1], [0], [0], [1], [0, 0, 1, 1], [], []>} : vector<8x24xbf16>, vector<24x128xbf16>, vector<8x128xf32> -> vector<8x128xf32>
    %c0_27 = arith.constant 0 : index
    %c0_28 = arith.constant 0 : index
    %c0_29 = arith.constant 0 : index
    %52 = vector.load %arg6[%c0_27, %c0_28, %c0_29] : memref<3x8x1xf32, #tpu.memory_space<vmem>>, vector<1x8x1xf32>
    %53 = vector.shape_cast %52 : vector<1x8x1xf32> to vector<8x1xf32>
    %54 = vector.broadcast %53 : vector<8x1xf32> to vector<8x128xf32>
    %55 = arith.addf %51, %54 : vector<8x128xf32>
    %cst_30 = arith.constant 0.000000e+00 : f32
    %56 = vector.broadcast %cst_30 : f32 to vector<8x128xf32>
    %57 = arith.maximumf %55, %56 : vector<8x128xf32>
    %c0_31 = arith.constant 0 : index
    %c0_32 = arith.constant 0 : index
    %c0_33 = arith.constant 0 : index
    %58 = vector.load %arg7[%c0_31, %c0_32, %c0_33] : memref<3x8x1xf32, #tpu.memory_space<vmem>>, vector<1x8x1xf32>
    %59 = vector.shape_cast %58 : vector<1x8x1xf32> to vector<8x1xf32>
    %c0_34 = arith.constant 0 : index
    %c0_35 = arith.constant 0 : index
    %c0_36 = arith.constant 0 : index
    %60 = vector.load %arg8[%c0_34, %c0_35, %c0_36] : memref<3x8x1xf32, #tpu.memory_space<vmem>>, vector<1x8x1xf32>
    %61 = vector.shape_cast %60 : vector<1x8x1xf32> to vector<8x1xf32>
    %cst_37 = arith.constant dense<0.000000e+00> : vector<8xf32>
    %62 = vector.multi_reduction <add>, %57, %cst_37 [1] : vector<8x128xf32> to vector<8xf32>
    %63 = vector.shape_cast %62 : vector<8xf32> to vector<8x1xf32>
    %64 = arith.mulf %57, %57 : vector<8x128xf32>
    %cst_38 = arith.constant dense<0.000000e+00> : vector<8xf32>
    %65 = vector.multi_reduction <add>, %64, %cst_38 [1] : vector<8x128xf32> to vector<8xf32>
    %66 = vector.shape_cast %65 : vector<8xf32> to vector<8x1xf32>
    %cst_39 = arith.constant 7.812500e-03 : f32
    %67 = vector.broadcast %cst_39 : f32 to vector<8x1xf32>
    %68 = arith.mulf %63, %67 : vector<8x1xf32>
    %cst_40 = arith.constant 7.812500e-03 : f32
    %69 = vector.broadcast %cst_40 : f32 to vector<8x1xf32>
    %70 = arith.mulf %66, %69 : vector<8x1xf32>
    %71 = arith.mulf %68, %68 : vector<8x1xf32>
    %72 = arith.subf %70, %71 : vector<8x1xf32>
    %cst_41 = arith.constant 9.99999974E-6 : f32
    %73 = vector.broadcast %cst_41 : f32 to vector<8x1xf32>
    %74 = arith.addf %72, %73 : vector<8x1xf32>
    %75 = math.rsqrt %74 : vector<8x1xf32>
    %76 = arith.mulf %59, %75 : vector<8x1xf32>
    %77 = vector.broadcast %76 : vector<8x1xf32> to vector<8x128xf32>
    %78 = arith.mulf %57, %77 : vector<8x128xf32>
    %79 = arith.mulf %68, %76 : vector<8x1xf32>
    %80 = arith.subf %61, %79 : vector<8x1xf32>
    %81 = vector.broadcast %80 : vector<8x1xf32> to vector<8x128xf32>
    %82 = arith.addf %78, %81 : vector<8x128xf32>
    %c0_42 = arith.constant 0 : index
    %c0_43 = arith.constant 0 : index
    %c0_44 = arith.constant 0 : index
    %83 = vector.load %arg9[%c0_42, %c0_43, %c0_44] : memref<4x32x8xbf16, #tpu.memory_space<vmem>>, vector<1x32x8xbf16>
    %84 = vector.shape_cast %83 : vector<1x32x8xbf16> to vector<32x8xbf16>
    %85 = arith.truncf %82 : vector<8x128xf32> to vector<8x128xbf16>
    %cst_45 = arith.constant dense<0.000000e+00> : vector<32x128xf32>
    %86 = tpu.matmul %84, %85, %cst_45 {dimension_numbers = #tpu.dot_dimension_numbers<[1], [0], [0], [1], [0, 0, 1, 1], [], []>} : vector<32x8xbf16>, vector<8x128xbf16>, vector<32x128xf32> -> vector<32x128xf32>
    %87 = arith.addf %35, %86 : vector<32x128xf32>
    %88 = vector.extract_strided_slice %30 {offsets = [8, 0], sizes = [8, 128], strides = [1, 1]} : vector<32x128xf32> to vector<8x128xf32>
    %89 = arith.addf %82, %88 : vector<8x128xf32>
    %c2_i32_46 = arith.constant 2 : i32
    %90 = tpu.dynamic_rotate %89 by %c2_i32_46 dim 1 : vector<8x128xf32>, i32 -> vector<8x128xf32>
    %c0_47 = arith.constant 0 : index
    %c0_48 = arith.constant 0 : index
    %c0_49 = arith.constant 0 : index
    %91 = vector.load %arg17[%c0_47, %c0_48, %c0_49] : memref<3x1x128xf32, #tpu.memory_space<vmem>>, vector<1x1x128xf32>
    %92 = vector.shape_cast %91 : vector<1x1x128xf32> to vector<1x128xf32>
    %93 = vector.broadcast %92 : vector<1x128xf32> to vector<8x128xf32>
    %94 = arith.mulf %90, %93 : vector<8x128xf32>
    %c126_i32_50 = arith.constant 126 : i32
    %95 = tpu.dynamic_rotate %89 by %c126_i32_50 dim 1 : vector<8x128xf32>, i32 -> vector<8x128xf32>
    %c2_51 = arith.constant 2 : index
    %c0_52 = arith.constant 0 : index
    %c0_53 = arith.constant 0 : index
    %96 = vector.load %arg17[%c2_51, %c0_52, %c0_53] : memref<3x1x128xf32, #tpu.memory_space<vmem>>, vector<1x1x128xf32>
    %97 = vector.shape_cast %96 : vector<1x1x128xf32> to vector<1x128xf32>
    %98 = vector.broadcast %97 : vector<1x128xf32> to vector<8x128xf32>
    %99 = arith.mulf %95, %98 : vector<8x128xf32>
    %100 = tpu.concatenate %94, %89, %99 in 0 : vector<8x128xf32>, vector<8x128xf32>, vector<8x128xf32> -> vector<24x128xf32>
    %101 = arith.truncf %100 : vector<24x128xf32> to vector<24x128xbf16>
    %c1 = arith.constant 1 : index
    %c0_54 = arith.constant 0 : index
    %c0_55 = arith.constant 0 : index
    %102 = vector.load %arg5[%c1, %c0_54, %c0_55] : memref<3x8x24xbf16, #tpu.memory_space<vmem>>, vector<1x8x24xbf16>
    %103 = vector.shape_cast %102 : vector<1x8x24xbf16> to vector<8x24xbf16>
    %cst_56 = arith.constant dense<0.000000e+00> : vector<8x128xf32>
    %104 = tpu.matmul %103, %101, %cst_56 {dimension_numbers = #tpu.dot_dimension_numbers<[1], [0], [0], [1], [0, 0, 1, 1], [], []>} : vector<8x24xbf16>, vector<24x128xbf16>, vector<8x128xf32> -> vector<8x128xf32>
    %c1_57 = arith.constant 1 : index
    %c0_58 = arith.constant 0 : index
    %c0_59 = arith.constant 0 : index
    %105 = vector.load %arg6[%c1_57, %c0_58, %c0_59] : memref<3x8x1xf32, #tpu.memory_space<vmem>>, vector<1x8x1xf32>
    %106 = vector.shape_cast %105 : vector<1x8x1xf32> to vector<8x1xf32>
    %107 = vector.broadcast %106 : vector<8x1xf32> to vector<8x128xf32>
    %108 = arith.addf %104, %107 : vector<8x128xf32>
    %cst_60 = arith.constant 0.000000e+00 : f32
    %109 = vector.broadcast %cst_60 : f32 to vector<8x128xf32>
    %110 = arith.maximumf %108, %109 : vector<8x128xf32>
    %c1_61 = arith.constant 1 : index
    %c0_62 = arith.constant 0 : index
    %c0_63 = arith.constant 0 : index
    %111 = vector.load %arg7[%c1_61, %c0_62, %c0_63] : memref<3x8x1xf32, #tpu.memory_space<vmem>>, vector<1x8x1xf32>
    %112 = vector.shape_cast %111 : vector<1x8x1xf32> to vector<8x1xf32>
    %c1_64 = arith.constant 1 : index
    %c0_65 = arith.constant 0 : index
    %c0_66 = arith.constant 0 : index
    %113 = vector.load %arg8[%c1_64, %c0_65, %c0_66] : memref<3x8x1xf32, #tpu.memory_space<vmem>>, vector<1x8x1xf32>
    %114 = vector.shape_cast %113 : vector<1x8x1xf32> to vector<8x1xf32>
    %cst_67 = arith.constant dense<0.000000e+00> : vector<8xf32>
    %115 = vector.multi_reduction <add>, %110, %cst_67 [1] : vector<8x128xf32> to vector<8xf32>
    %116 = vector.shape_cast %115 : vector<8xf32> to vector<8x1xf32>
    %117 = arith.mulf %110, %110 : vector<8x128xf32>
    %cst_68 = arith.constant dense<0.000000e+00> : vector<8xf32>
    %118 = vector.multi_reduction <add>, %117, %cst_68 [1] : vector<8x128xf32> to vector<8xf32>
    %119 = vector.shape_cast %118 : vector<8xf32> to vector<8x1xf32>
    %cst_69 = arith.constant 7.812500e-03 : f32
    %120 = vector.broadcast %cst_69 : f32 to vector<8x1xf32>
    %121 = arith.mulf %116, %120 : vector<8x1xf32>
    %cst_70 = arith.constant 7.812500e-03 : f32
    %122 = vector.broadcast %cst_70 : f32 to vector<8x1xf32>
    %123 = arith.mulf %119, %122 : vector<8x1xf32>
    %124 = arith.mulf %121, %121 : vector<8x1xf32>
    %125 = arith.subf %123, %124 : vector<8x1xf32>
    %cst_71 = arith.constant 9.99999974E-6 : f32
    %126 = vector.broadcast %cst_71 : f32 to vector<8x1xf32>
    %127 = arith.addf %125, %126 : vector<8x1xf32>
    %128 = math.rsqrt %127 : vector<8x1xf32>
    %129 = arith.mulf %112, %128 : vector<8x1xf32>
    %130 = vector.broadcast %129 : vector<8x1xf32> to vector<8x128xf32>
    %131 = arith.mulf %110, %130 : vector<8x128xf32>
    %132 = arith.mulf %121, %129 : vector<8x1xf32>
    %133 = arith.subf %114, %132 : vector<8x1xf32>
    %134 = vector.broadcast %133 : vector<8x1xf32> to vector<8x128xf32>
    %135 = arith.addf %131, %134 : vector<8x128xf32>
    %c1_72 = arith.constant 1 : index
    %c0_73 = arith.constant 0 : index
    %c0_74 = arith.constant 0 : index
    %136 = vector.load %arg9[%c1_72, %c0_73, %c0_74] : memref<4x32x8xbf16, #tpu.memory_space<vmem>>, vector<1x32x8xbf16>
    %137 = vector.shape_cast %136 : vector<1x32x8xbf16> to vector<32x8xbf16>
    %138 = arith.truncf %135 : vector<8x128xf32> to vector<8x128xbf16>
    %cst_75 = arith.constant dense<0.000000e+00> : vector<32x128xf32>
    %139 = tpu.matmul %137, %138, %cst_75 {dimension_numbers = #tpu.dot_dimension_numbers<[1], [0], [0], [1], [0, 0, 1, 1], [], []>} : vector<32x8xbf16>, vector<8x128xbf16>, vector<32x128xf32> -> vector<32x128xf32>
    %140 = arith.addf %87, %139 : vector<32x128xf32>
    %141 = vector.extract_strided_slice %30 {offsets = [16, 0], sizes = [8, 128], strides = [1, 1]} : vector<32x128xf32> to vector<8x128xf32>
    %142 = arith.addf %135, %141 : vector<8x128xf32>
    %c2_i32_76 = arith.constant 2 : i32
    %143 = tpu.dynamic_rotate %142 by %c2_i32_76 dim 1 : vector<8x128xf32>, i32 -> vector<8x128xf32>
    %c0_77 = arith.constant 0 : index
    %c0_78 = arith.constant 0 : index
    %c0_79 = arith.constant 0 : index
    %144 = vector.load %arg17[%c0_77, %c0_78, %c0_79] : memref<3x1x128xf32, #tpu.memory_space<vmem>>, vector<1x1x128xf32>
    %145 = vector.shape_cast %144 : vector<1x1x128xf32> to vector<1x128xf32>
    %146 = vector.broadcast %145 : vector<1x128xf32> to vector<8x128xf32>
    %147 = arith.mulf %143, %146 : vector<8x128xf32>
    %c126_i32_80 = arith.constant 126 : i32
    %148 = tpu.dynamic_rotate %142 by %c126_i32_80 dim 1 : vector<8x128xf32>, i32 -> vector<8x128xf32>
    %c2_81 = arith.constant 2 : index
    %c0_82 = arith.constant 0 : index
    %c0_83 = arith.constant 0 : index
    %149 = vector.load %arg17[%c2_81, %c0_82, %c0_83] : memref<3x1x128xf32, #tpu.memory_space<vmem>>, vector<1x1x128xf32>
    %150 = vector.shape_cast %149 : vector<1x1x128xf32> to vector<1x128xf32>
    %151 = vector.broadcast %150 : vector<1x128xf32> to vector<8x128xf32>
    %152 = arith.mulf %148, %151 : vector<8x128xf32>
    %153 = tpu.concatenate %147, %142, %152 in 0 : vector<8x128xf32>, vector<8x128xf32>, vector<8x128xf32> -> vector<24x128xf32>
    %154 = arith.truncf %153 : vector<24x128xf32> to vector<24x128xbf16>
    %c2_84 = arith.constant 2 : index
    %c0_85 = arith.constant 0 : index
    %c0_86 = arith.constant 0 : index
    %155 = vector.load %arg5[%c2_84, %c0_85, %c0_86] : memref<3x8x24xbf16, #tpu.memory_space<vmem>>, vector<1x8x24xbf16>
    %156 = vector.shape_cast %155 : vector<1x8x24xbf16> to vector<8x24xbf16>
    %cst_87 = arith.constant dense<0.000000e+00> : vector<8x128xf32>
    %157 = tpu.matmul %156, %154, %cst_87 {dimension_numbers = #tpu.dot_dimension_numbers<[1], [0], [0], [1], [0, 0, 1, 1], [], []>} : vector<8x24xbf16>, vector<24x128xbf16>, vector<8x128xf32> -> vector<8x128xf32>
    %c2_88 = arith.constant 2 : index
    %c0_89 = arith.constant 0 : index
    %c0_90 = arith.constant 0 : index
    %158 = vector.load %arg6[%c2_88, %c0_89, %c0_90] : memref<3x8x1xf32, #tpu.memory_space<vmem>>, vector<1x8x1xf32>
    %159 = vector.shape_cast %158 : vector<1x8x1xf32> to vector<8x1xf32>
    %160 = vector.broadcast %159 : vector<8x1xf32> to vector<8x128xf32>
    %161 = arith.addf %157, %160 : vector<8x128xf32>
    %cst_91 = arith.constant 0.000000e+00 : f32
    %162 = vector.broadcast %cst_91 : f32 to vector<8x128xf32>
    %163 = arith.maximumf %161, %162 : vector<8x128xf32>
    %c2_92 = arith.constant 2 : index
    %c0_93 = arith.constant 0 : index
    %c0_94 = arith.constant 0 : index
    %164 = vector.load %arg7[%c2_92, %c0_93, %c0_94] : memref<3x8x1xf32, #tpu.memory_space<vmem>>, vector<1x8x1xf32>
    %165 = vector.shape_cast %164 : vector<1x8x1xf32> to vector<8x1xf32>
    %c2_95 = arith.constant 2 : index
    %c0_96 = arith.constant 0 : index
    %c0_97 = arith.constant 0 : index
    %166 = vector.load %arg8[%c2_95, %c0_96, %c0_97] : memref<3x8x1xf32, #tpu.memory_space<vmem>>, vector<1x8x1xf32>
    %167 = vector.shape_cast %166 : vector<1x8x1xf32> to vector<8x1xf32>
    %cst_98 = arith.constant dense<0.000000e+00> : vector<8xf32>
    %168 = vector.multi_reduction <add>, %163, %cst_98 [1] : vector<8x128xf32> to vector<8xf32>
    %169 = vector.shape_cast %168 : vector<8xf32> to vector<8x1xf32>
    %170 = arith.mulf %163, %163 : vector<8x128xf32>
    %cst_99 = arith.constant dense<0.000000e+00> : vector<8xf32>
    %171 = vector.multi_reduction <add>, %170, %cst_99 [1] : vector<8x128xf32> to vector<8xf32>
    %172 = vector.shape_cast %171 : vector<8xf32> to vector<8x1xf32>
    %cst_100 = arith.constant 7.812500e-03 : f32
    %173 = vector.broadcast %cst_100 : f32 to vector<8x1xf32>
    %174 = arith.mulf %169, %173 : vector<8x1xf32>
    %cst_101 = arith.constant 7.812500e-03 : f32
    %175 = vector.broadcast %cst_101 : f32 to vector<8x1xf32>
    %176 = arith.mulf %172, %175 : vector<8x1xf32>
    %177 = arith.mulf %174, %174 : vector<8x1xf32>
    %178 = arith.subf %176, %177 : vector<8x1xf32>
    %cst_102 = arith.constant 9.99999974E-6 : f32
    %179 = vector.broadcast %cst_102 : f32 to vector<8x1xf32>
    %180 = arith.addf %178, %179 : vector<8x1xf32>
    %181 = math.rsqrt %180 : vector<8x1xf32>
    %182 = arith.mulf %165, %181 : vector<8x1xf32>
    %183 = vector.broadcast %182 : vector<8x1xf32> to vector<8x128xf32>
    %184 = arith.mulf %163, %183 : vector<8x128xf32>
    %185 = arith.mulf %174, %182 : vector<8x1xf32>
    %186 = arith.subf %167, %185 : vector<8x1xf32>
    %187 = vector.broadcast %186 : vector<8x1xf32> to vector<8x128xf32>
    %188 = arith.addf %184, %187 : vector<8x128xf32>
    %c2_103 = arith.constant 2 : index
    %c0_104 = arith.constant 0 : index
    %c0_105 = arith.constant 0 : index
    %189 = vector.load %arg9[%c2_103, %c0_104, %c0_105] : memref<4x32x8xbf16, #tpu.memory_space<vmem>>, vector<1x32x8xbf16>
    %190 = vector.shape_cast %189 : vector<1x32x8xbf16> to vector<32x8xbf16>
    %191 = arith.truncf %188 : vector<8x128xf32> to vector<8x128xbf16>
    %cst_106 = arith.constant dense<0.000000e+00> : vector<32x128xf32>
    %192 = tpu.matmul %190, %191, %cst_106 {dimension_numbers = #tpu.dot_dimension_numbers<[1], [0], [0], [1], [0, 0, 1, 1], [], []>} : vector<32x8xbf16>, vector<8x128xbf16>, vector<32x128xf32> -> vector<32x128xf32>
    %193 = arith.addf %140, %192 : vector<32x128xf32>
    %c0_107 = arith.constant 0 : index
    %c0_108 = arith.constant 0 : index
    %194 = vector.load %arg10[%c0_107, %c0_108] : memref<32x1xf32, #tpu.memory_space<vmem>>, vector<32x1xf32>
    %195 = vector.broadcast %194 : vector<32x1xf32> to vector<32x128xf32>
    %196 = arith.addf %193, %195 : vector<32x128xf32>
    %cst_109 = arith.constant 0.000000e+00 : f32
    %197 = vector.broadcast %cst_109 : f32 to vector<32x128xf32>
    %198 = arith.maximumf %196, %197 : vector<32x128xf32>
    %c0_110 = arith.constant 0 : index
    %c0_111 = arith.constant 0 : index
    %199 = vector.load %arg11[%c0_110, %c0_111] : memref<32x1xf32, #tpu.memory_space<vmem>>, vector<32x1xf32>
    %c0_112 = arith.constant 0 : index
    %c0_113 = arith.constant 0 : index
    %200 = vector.load %arg12[%c0_112, %c0_113] : memref<32x1xf32, #tpu.memory_space<vmem>>, vector<32x1xf32>
    %cst_114 = arith.constant dense<0.000000e+00> : vector<32xf32>
    %201 = vector.multi_reduction <add>, %198, %cst_114 [1] : vector<32x128xf32> to vector<32xf32>
    %202 = vector.shape_cast %201 : vector<32xf32> to vector<32x1xf32>
    %203 = arith.mulf %198, %198 : vector<32x128xf32>
    %cst_115 = arith.constant dense<0.000000e+00> : vector<32xf32>
    %204 = vector.multi_reduction <add>, %203, %cst_115 [1] : vector<32x128xf32> to vector<32xf32>
    %205 = vector.shape_cast %204 : vector<32xf32> to vector<32x1xf32>
    %cst_116 = arith.constant 7.812500e-03 : f32
    %206 = vector.broadcast %cst_116 : f32 to vector<32x1xf32>
    %207 = arith.mulf %202, %206 : vector<32x1xf32>
    %cst_117 = arith.constant 7.812500e-03 : f32
    %208 = vector.broadcast %cst_117 : f32 to vector<32x1xf32>
    %209 = arith.mulf %205, %208 : vector<32x1xf32>
    %210 = arith.mulf %207, %207 : vector<32x1xf32>
    %211 = arith.subf %209, %210 : vector<32x1xf32>
    %cst_118 = arith.constant 9.99999974E-6 : f32
    %212 = vector.broadcast %cst_118 : f32 to vector<32x1xf32>
    %213 = arith.addf %211, %212 : vector<32x1xf32>
    %214 = math.rsqrt %213 : vector<32x1xf32>
    %215 = arith.mulf %199, %214 : vector<32x1xf32>
    %216 = vector.broadcast %215 : vector<32x1xf32> to vector<32x128xf32>
    %217 = arith.mulf %198, %216 : vector<32x128xf32>
    %218 = arith.mulf %207, %215 : vector<32x1xf32>
    %219 = arith.subf %200, %218 : vector<32x1xf32>
    %220 = vector.broadcast %219 : vector<32x1xf32> to vector<32x128xf32>
    %221 = arith.addf %217, %220 : vector<32x128xf32>
    %c0_119 = arith.constant 0 : index
    %c0_120 = arith.constant 0 : index
    %222 = vector.load %arg13[%c0_119, %c0_120] : memref<32x16xbf16, #tpu.memory_space<vmem>>, vector<32x16xbf16>
    %cst_121 = arith.constant dense<0.000000e+00> : vector<32x128xf32>
    %223 = tpu.matmul %222, %0, %cst_121 {dimension_numbers = #tpu.dot_dimension_numbers<[1], [0], [0], [1], [0, 0, 1, 1], [], []>} : vector<32x16xbf16>, vector<16x128xbf16>, vector<32x128xf32> -> vector<32x128xf32>
    %224 = arith.addf %221, %223 : vector<32x128xf32>
    %225 = arith.truncf %224 : vector<32x128xf32> to vector<32x128xbf16>
    %c0_122 = arith.constant 0 : index
    %c0_123 = arith.constant 0 : index
    %226 = vector.load %arg18[%c0_122, %c0_123] : memref<128x2xbf16, #tpu.memory_space<vmem>>, vector<128x2xbf16>
    %cst_124 = arith.constant dense<0.000000e+00> : vector<32x2xf32>
    %227 = tpu.matmul %225, %226, %cst_124 {dimension_numbers = #tpu.dot_dimension_numbers<[1], [0], [0], [1], [0, 0, 1, 1], [], []>} : vector<32x128xbf16>, vector<128x2xbf16>, vector<32x2xf32> -> vector<32x2xf32>
    %c0_125 = arith.constant 0 : index
    %c0_126 = arith.constant 0 : index
    %228 = vector.load %arg14[%c0_125, %c0_126] : memref<32x32xbf16, #tpu.memory_space<vmem>>, vector<32x32xbf16>
    %229 = arith.truncf %227 : vector<32x2xf32> to vector<32x2xbf16>
    %cst_127 = arith.constant dense<0.000000e+00> : vector<32x2xf32>
    %230 = tpu.matmul %228, %229, %cst_127 {dimension_numbers = #tpu.dot_dimension_numbers<[1], [0], [0], [1], [0, 0, 1, 1], [], []>} : vector<32x32xbf16>, vector<32x2xbf16>, vector<32x2xf32> -> vector<32x2xf32>
    %c0_128 = arith.constant 0 : index
    %c0_129 = arith.constant 0 : index
    %231 = vector.load %arg15[%c0_128, %c0_129] : memref<32x1xf32, #tpu.memory_space<vmem>>, vector<32x1xf32>
    %232 = vector.broadcast %231 : vector<32x1xf32> to vector<32x2xf32>
    %233 = arith.addf %230, %232 : vector<32x2xf32>
    %234 = arith.negf %233 : vector<32x2xf32>
    %235 = math.exp %234 : vector<32x2xf32>
    %cst_130 = arith.constant 1.000000e+00 : f32
    %236 = vector.broadcast %cst_130 : f32 to vector<32x2xf32>
    %237 = arith.addf %236, %235 : vector<32x2xf32>
    %238 = arith.divf %236, %237 : vector<32x2xf32>
    %239 = arith.truncf %238 : vector<32x2xf32> to vector<32x2xbf16>
    %c0_131 = arith.constant 0 : index
    %c0_132 = arith.constant 0 : index
    %240 = vector.load %arg19[%c0_131, %c0_132] : memref<2x128xbf16, #tpu.memory_space<vmem>>, vector<2x128xbf16>
    %cst_133 = arith.constant dense<0.000000e+00> : vector<32x128xf32>
    %241 = tpu.matmul %239, %240, %cst_133 {dimension_numbers = #tpu.dot_dimension_numbers<[1], [0], [0], [1], [0, 0, 1, 1], [], []>} : vector<32x2xbf16>, vector<2x128xbf16>, vector<32x128xf32> -> vector<32x128xf32>
    %c0_134 = arith.constant 0 : index
    %c0_135 = arith.constant 0 : index
    %242 = vector.load %arg16[%c0_134, %c0_135] : memref<32x1xf32, #tpu.memory_space<vmem>>, vector<32x1xf32>
    %243 = vector.broadcast %242 : vector<32x1xf32> to vector<32x128xf32>
    %244 = arith.addf %224, %243 : vector<32x128xf32>
    %245 = arith.mulf %244, %241 : vector<32x128xf32>
    %c0_136 = arith.constant 0 : index
    %c0_137 = arith.constant 0 : index
    %246 = vector.load %arg20[%c0_136, %c0_137] : memref<32x128xf32, #tpu.memory_space<vmem>>, vector<32x128xf32>
    tpu.vector_store %arg20[%c0_136, %c0_137], %245 {strides = array<i32>} : memref<32x128xf32, #tpu.memory_space<vmem>>, vector<32x128xf32>,
    return
  }
}

</mosaic_0001>

<bundles_post_ra>
// kernel: tpu_custom_call.1
= control target key start
LH: loop header
LB: loop body
LE: loop exit
PB: predicated region body
PF: predicated region fallthrough
CT: control target
= control target key end

     0   :  { %s2224_s0 = inlined_call_operand.vmem [shape: bf16[16,128], index: 0, kind: input, shape index: {}]   ;;  %s2225_s1 = inlined_call_operand.vmem [shape: bf16[32,16], index: 1, kind: input, shape index: {}]   ;;  %s2226_s2 = inlined_call_operand.vmem [shape: f32[32,1], index: 2, kind: input, shape index: {}]   ;;  %s2227_s3 = inlined_call_operand.vmem [shape: f32[32,1], index: 3, kind: input, shape index: {}]   ;;  %s2228_s4 = inlined_call_operand.vmem [shape: f32[32,1], index: 4, kind: input, shape index: {}]   ;;  %s2229_s5 = inlined_call_operand.vmem [shape: bf16[3,8,24], index: 5, kind: input, shape index: {}]   ;;  %s2230_s6 = inlined_call_operand.vmem [shape: f32[3,8,1], index: 6, kind: input, shape index: {}]   ;;  %s2231_s7 = inlined_call_operand.vmem [shape: f32[3,8,1], index: 7, kind: input, shape index: {}]   ;;  %s2232_s8 = inlined_call_operand.vmem [shape: f32[3,8,1], index: 8, kind: input, shape index: {}]   ;;  %s2233_s9 = inlined_call_operand.vmem [shape: bf16[4,32,8], index: 9, kind: input, shape index: {}]   ;;  %s2234_s10 = inlined_call_operand.vmem [shape: f32[32,1], index: 10, kind: input, shape index: {}]   ;;  %s2235_s11 = inlined_call_operand.vmem [shape: f32[32,1], index: 11, kind: input, shape index: {}]   ;;  %s2236_s12 = inlined_call_operand.vmem [shape: f32[32,1], index: 12, kind: input, shape index: {}]   ;;  %s2237_s13 = inlined_call_operand.vmem [shape: bf16[32,16], index: 13, kind: input, shape index: {}]   ;;  %s2238_s14 = inlined_call_operand.vmem [shape: bf16[32,32], index: 14, kind: input, shape index: {}]   ;;  %s2239_s15 = inlined_call_operand.vmem [shape: f32[32,1], index: 15, kind: input, shape index: {}]   ;;  %s2240_s16 = inlined_call_operand.vmem [shape: f32[32,1], index: 16, kind: input, shape index: {}]   ;;  %s2241_s17 = inlined_call_operand.vmem [shape: f32[3,1,128], index: 17, kind: input, shape index: {}]   ;;  %s2242_s18 = inlined_call_operand.vmem [shape: bf16[128,2], index: 18, kind: input, shape index: {}]   ;;  %s2243_s19 = inlined_call_operand.vmem [shape: bf16[2,128], index: 19, kind: input, shape index: {}]   ;;  %s2244_s20 = inlined_call_operand.hbm [shape: f32[32,128], index: 20, kind: output, shape index: {}]  }
   0x1   :  { %2249 = sst [smem:[#allocation5_spill]] %s2224_s0 }
   0x2   :  { %2250 = sst [smem:[#allocation6_spill]] %s2225_s1 }
   0x3   :  { %2251 = sst [smem:[#allocation7_spill]] %s2226_s2 }
   0x4   :  { %2252 = sst [smem:[#allocation8_spill]] %s2227_s3 }
   0x5   :  { %2253 = sst [smem:[#allocation9_spill]] %s2228_s4 }
   0x6   :  { %s2254_s23 = sld [smem:[#allocation5_spill]]  ;;  %vm113_vm0 = vcmask 130048   ;;  %s2255_s25 = sld [smem:[#allocation6_spill]]  ;;  %v1772_v3 = vmov 0  }
   0x7   :  { %1685 = vset.pattern.permute.xlu0 %v1772_v3  ;;  %s2256_s4 = sld [smem:[#allocation7_spill]]  ;;  %1686 = vset.pattern.permute.xlu1 %v1772_v3 }
   0xc   :  { %v1888_v0 = vld [vmem:[%s2254_s23] sm:$0xff]   ;;  %v1689_v2 = vld [vmem:[%s2255_s25 + $0x8] sm:$0xff]  }
   0xd   :  { %v1688_v1 = vld [vmem:[%s2255_s25] sm:$0xff]   ;;  %1566 = vmatprep.subr.bf16.mxu0 %v1888_v0 }
   0xe   :  { %1567 = vmatpush3.bf16.msra.mxu0 %v1888_v0  ;;  %1568 = vmatprep.mubr.msk.bf16.mxu0 %vm113_vm0, %v1688_v1  ;;  %v73_v4 = vld [vmem:[%s2256_s4] sm:$0xff] }
   0xf   :  { %79 = vperm.xlu0 %1685, %v73_v4  }
  0x11   :  { %1569 = vmatmul.mubr.msk.bf16.vlgmr.msra.gmra.mrb[0].mxu0 %vm113_vm0, %v1689_v2 }
  0x12   :  { %25 = vsyncpa [#allocation3], 0  ;;  %v315_v13 = vld [vmem:[%s2230_s6] sm:$0xff]  ;;  %s2257_s1 = sld [smem:[#allocation8_spill]]  ;;  %s2258_s24 = sld [smem:[#allocation9_spill]]  ;;  %v1773_v27 = vmov 0.0  }
  0x13   :  { %1572 = vmatprep.subr.bf16.mxu0 %v1773_v27  ;;  %1592 = vmatprep.subr.bf16.mxu1 %v1773_v27  ;;  %vm1774_vm1 = vmmov 0   ;;  %s1775_s2 = smov 2   ;;  %s1776_s25 = smov 126   ;;  %v74_v32 = vld [vmem:[%s2256_s4 + $0x8] sm:$0xff]  ;;  %v1930_v33 = vld [vmem:[%s2241_s17] ss:$0 sm:$0xff] }
  0x14   :  { %1576 = vmatprep.mubr.msk.bf16.mxu0 %vm1774_vm1, %v1773_v27  ;;  %1596 = vmatprep.mubr.msk.bf16.mxu1 %vm1774_vm1, %v1773_v27  ;;  %v1936_v36 = vld [vmem:[%s2241_s17 + $0x2] ss:$0 sm:$0xff]  ;;  %vm325_vm2 = vcmask 1043456   ;;  %vm321_vm3 = vcmask 195584   ;;  %vm413_vm4 = vcmask 64512   ;;  %vm1258_vm5 = vcmask 261120  }
  0x15   :  { %v314_v42 = vld [vmem:[%s2229_s5] sm:$0xf]  ;;  %vm1348_vm6 = vcmask 1040384   ;;  %vm1341_vm7 = vcmask 15360  }
  0x18   :  { %v173_v21 = vld [vmem:[%s2257_s1] sm:$0xff]  ;;  %v174_v63 = vld [vmem:[%s2257_s1 + $0x8] sm:$0xff] }
  0x19   :  { %v177_v24 = vld [vmem:[%s2258_s24] sm:$0xff]  ;;  %v178_v3 = vld [vmem:[%s2258_s24 + $0x8] sm:$0xff] }
  0x8e   :  { %v80_v5 = vpop.permute.xlu0 %79 }
  0xe4   :  { %v1903_v6 = vpop.f32.mrb[0].mxu0 }
  0xe5   :  { %v154_v7 = vpop.f32.mrb[1].mxu0 }
  0xe6   :  { %v155_v8 = vadd.f32 %v154_v7, %v80_v5  ;;  %v1905_v9 = vpop.f32.mrb[2].mxu0 }
  0xe7   :  { %v157_v10 = vpop.f32.mrb[3].mxu0 }
  0xe8   :  { %v169_v11 = vmax.f32 %v155_v8, 0.0 }
  0xea   :  { %181 = vadd.xlane.f32.xlu0 %v169_v11  ;;  %v189_v12 = vmul.f32 %v169_v11, %v169_v11 }
  0xec   :  { %193 = vadd.xlane.f32.xlu1 %v189_v12 }
 0x100   :  { %318 = vperm.xlu0 %1685, %v315_v13  }
 0x177   :  { %v182_v14 = vpop.xlane.xlu0 %181 }
 0x178   :  { %v201_v15 = vmul.f32 0.0078125, %v182_v14  ;;  %v370_v14 = vld [vmem:[%s2231_s7] sm:$0xff] }
 0x179   :  { %v194_v16 = vpop.xlane.xlu1 %193 }
 0x17a   :  { %v209_v17 = vmul.f32 %v201_v15, %v201_v15  ;;  %v205_v18 = vmul.f32 0.0078125, %v194_v16 }
 0x17c   :  { %v213_v19 = vsub.f32 %v205_v18, %v209_v17  ;;  %v371_v17 = vld [vmem:[%s2232_s8] sm:$0xff] }
 0x17e   :  { %v217_v20 = vadd.f32 1e-05, %v213_v19 }
 0x17f   :  { %v319_v53 = vpop.permute.xlu0 %318 }
 0x180   :  { %1710 = vrsqrt.f32 %v217_v20 }
 0x18a   :  { %v1711_v22 = vpop.eup %1710 }
 0x18b   :  { %v225_v23 = vmul.f32 %v1711_v22, %v173_v21 }
 0x18d   :  { %231 = vperm.xlu1 %1686, %v225_v23   ;;  %v253_v25 = vmul.f32 %v225_v23, %v201_v15 }
 0x18f   :  { %v257_v26 = vsub.f32 %v177_v24, %v253_v25 }
 0x191   :  { %263 = vperm.xlu1 %1686, %v257_v26  }
 0x20c   :  { %v232_v28 = vpop.permute.xlu1 %231 }
 0x20d   :  { %v249_v29 = vmul.f32 %v232_v28, %v169_v11 }
 0x210   :  { %v264_v30 = vpop.permute.xlu1 %263 }
 0x211   :  { %v281_v31 = vadd.f32 %v264_v30, %v249_v29 }
 0x213   :  { %291 = vrot.lane.b32.xlu1 %v281_v31, %s1775_s2 }
 0x217   :  { %301 = vrot.lane.b32.xlu1 %v281_v31, %s1776_s25 }
 0x21b   :  { %84 = vperm.xlu1 %1686, %v74_v32   ;;  %v1475_v32 = vld [vmem:[%s2230_s6 + $0x8] sm:$0xff] }
 0x285   :  { %v292_v34 = vpop.permute.xlu1 %291 }
 0x286   :  { %v300_v35 = vmul.f32 %v1930_v33, %v292_v34  ;;  %v75_v34 = vld [vmem:[%s2256_s4 + $0x10] sm:$0xff] }
 0x288   :  { %v312_v37 = vpack.c.bf16 %v281_v31, %v300_v35 }
 0x289   :  { %v302_v38 = vpop.permute.xlu1 %301 }
 0x28a   :  { %v311_v39 = vmul.f32 %v1936_v36, %v302_v38  ;;  %1573 = vmatpush3.bf16.msra.mxu0 %v312_v37 }
 0x28b   :  { %1574 = vmatprep.subr.bf16.mxu0 %v1773_v27 }
 0x28c   :  { %v313_v40 = vpack.c.bf16 %v311_v39, %v311_v39 }
 0x28e   :  { %v327_v41 = vsel %vm325_vm2, %v313_v40, 0 }
 0x28f   :  { %1575 = vmatpush3.bf16.msra.mxu0 %v327_v41 }
 0x292   :  { %1577 = vmatmul.mubr.msk.bf16.vlgmr.msra.gmra.mrb[4].mxu0 %vm321_vm3, %v314_v42 }
 0x29a   :  { %v85_v43 = vpop.permute.xlu1 %84 }
 0x29b   :  { %v158_v44 = vadd.f32 %v157_v10, %v85_v43  ;;  %v1474_v43 = vld [vmem:[%s2229_s5 + $0x4] sm:$0xf] }
 0x29d   :  { %v170_v45 = vmax.f32 %v158_v44, 0.0 }
 0x29f   :  { %183 = vadd.xlane.f32.xlu1 %v170_v45  ;;  %v190_v46 = vmul.f32 %v170_v45, %v170_v45 }
 0x2a3   :  { %195 = vadd.xlane.f32.xlu1 %v190_v46 }
 0x32c   :  { %v184_v47 = vpop.xlane.xlu1 %183 }
 0x32d   :  { %v202_v49 = vmul.f32 0.0078125, %v184_v47 }
 0x32f   :  { %v210_v51 = vmul.f32 %v202_v49, %v202_v49 }
 0x330   :  { %v196_v48 = vpop.xlane.xlu1 %195 }
 0x331   :  { %v206_v50 = vmul.f32 0.0078125, %v196_v48 }
 0x333   :  { %v214_v52 = vsub.f32 %v206_v50, %v210_v51 }
 0x335   :  { %v218_v55 = vadd.f32 1e-05, %v214_v52 }
 0x337   :  { %1712 = vrsqrt.f32 %v218_v55 }
 0x341   :  { %v1713_v62 = vpop.eup %1712 }
 0x342   :  { %v226_v1 = vmul.f32 %v1713_v62, %v174_v63 }
 0x344   :  { %v254_v2 = vmul.f32 %v226_v1, %v202_v49 }
 0x346   :  { %v258_v4 = vsub.f32 %v178_v3, %v254_v2 }
 0x365   :  { %v363_v54 = vpop.f32.mrb[4].mxu0 }
 0x366   :  { %v364_v56 = vadd.f32 %v363_v54, %v319_v53  ;;  %v1578_v57 = vpop.f32.mrb[5].mxu0 }
 0x367   :  { %v366_v58 = vpop.f32.mrb[6].mxu0 }
 0x368   :  { %v369_v59 = vmax.f32 %v364_v56, 0.0  ;;  %v1579_v60 = vpop.f32.mrb[7].mxu0 }
 0x36a   :  { %372 = vadd.xlane.f32.xlu0 %v369_v59  ;;  %v374_v61 = vmul.f32 %v369_v59, %v369_v59 }
 0x36c   :  { %375 = vadd.xlane.f32.xlu1 %v374_v61 }
 0x37d   :  { %236 = vperm.xlu1 %1686, %v226_v1  }
 0x381   :  { %268 = vperm.xlu1 %1686, %v258_v4  }
 0x3f7   :  { %v373_v5 = vpop.xlane.xlu0 %372 }
 0x3f8   :  { %v377_v7 = vmul.f32 0.0078125, %v373_v5 }
 0x3f9   :  { %v376_v8 = vpop.xlane.xlu1 %375 }
 0x3fa   :  { %v379_v10 = vmul.f32 %v377_v7, %v377_v7  ;;  %v378_v11 = vmul.f32 0.0078125, %v376_v8 }
 0x3fc   :  { %v380_v12 = vsub.f32 %v378_v11, %v379_v10  ;;  %v175_v10 = vld [vmem:[%s2257_s1 + $0x10] sm:$0xff] }
 0x3fd   :  { %v237_v20 = vpop.permute.xlu1 %236 }
 0x3fe   :  { %v381_v13 = vadd.f32 1e-05, %v380_v12  ;;  %v250_v23 = vmul.f32 %v237_v20, %v170_v45 }
 0x400   :  { %1714 = vrsqrt.f32 %v381_v13 }
 0x401   :  { %v269_v21 = vpop.permute.xlu1 %268 }
 0x402   :  { %v282_v26 = vadd.f32 %v269_v21, %v250_v23 }
 0x40a   :  { %v1715_v15 = vpop.eup %1714 }
 0x40b   :  { %v383_v16 = vmul.f32 %v1715_v15, %v370_v14  ;;  %v1478_v15 = vld [vmem:[%s2232_s8 + $0x8] sm:$0xff] }
 0x40d   :  { %386 = vperm.xlu0 %1685, %v383_v16   ;;  %v390_v18 = vmul.f32 %v383_v16, %v377_v7  ;;  %v1477_v7 = vld [vmem:[%s2231_s7 + $0x8] sm:$0xff]  ;;  %v179_v16 = vld [vmem:[%s2258_s24 + $0x10] sm:$0xff] }
 0x40f   :  { %v391_v19 = vsub.f32 %v371_v17, %v390_v18 }
 0x411   :  { %394 = vperm.xlu1 %1686, %v391_v19  }
 0x48c   :  { %v387_v22 = vpop.permute.xlu0 %386 }
 0x48d   :  { %v389_v24 = vmul.f32 %v387_v22, %v369_v59 }
 0x490   :  { %v395_v25 = vpop.permute.xlu1 %394 }
 0x491   :  { %v397_v28 = vadd.f32 %v395_v25, %v389_v24 }
 0x493   :  { %v402_v29 = vpack.c.bf16 %v397_v28, %v397_v28  ;;  %v540_v30 = vadd.f32 %v397_v28, %v282_v26 }
 0x495   :  { %544 = vrot.lane.b32.xlu0 %v540_v30, %s1776_s25  ;;  %541 = vrot.lane.b32.xlu1 %v540_v30, %s1775_s2  ;;  %v421_v31 = vsel %vm325_vm2, %v402_v29, 0 }
 0x496   :  { %1672 = vmatprep.subr.msk.bf16.mxu0 %vm325_vm2, %v402_v29 }
 0x497   :  { %1581 = vmatpush3.bf16.msra.mxu0 %v421_v31  ;;  %v76_v31 = vld [vmem:[%s2256_s4 + $0x18] sm:$0xff] }
 0x499   :  { %555 = vperm.xlu0 %1685, %v1475_v32   ;;  %89 = vperm.xlu1 %1686, %v75_v34  }
 0x507   :  { %v545_v35 = vpop.permute.xlu0 %544  ;;  %v542_v37 = vpop.permute.xlu1 %541 }
 0x508   :  { %v546_v38 = vmul.f32 %v1936_v36, %v545_v35  ;;  %v543_v39 = vmul.f32 %v1930_v33, %v542_v37 }
 0x50a   :  { %v547_v40 = vpack.c.bf16 %v540_v30, %v543_v39  ;;  %v548_v41 = vpack.c.bf16 %v546_v38, %v546_v38  ;;  %v1488_v30 = vld [vmem:[%s2230_s6 + $0x10] sm:$0xff] }
 0x50c   :  { %1593 = vmatpush3.bf16.msra.mxu1 %v547_v40  ;;  %v562_v42 = vsel %vm325_vm2, %v548_v41, 0  ;;  %v1487_v41 = vld [vmem:[%s2229_s5 + $0x8] sm:$0xf] }
 0x50d   :  { %1594 = vmatprep.subr.bf16.mxu1 %v1773_v27 }
 0x510   :  { %1595 = vmatpush3.bf16.msra.mxu1 %v562_v42 }
 0x511   :  { %1606 = vmatprep.subr.bf16.mxu1 %v1773_v27 }
 0x513   :  { %1597 = vmatmul.mubr.msk.bf16.vlgmr.msra.gmra.mrb[0].mxu1 %vm321_vm3, %v1474_v43 }
 0x514   :  { %1610 = vmatprep.mubr.msk.bf16.mxu1 %vm1774_vm1, %v1773_v27 }
 0x518   :  { %v90_v44 = vpop.permute.xlu1 %89  ;;  %v556_v47 = vpop.permute.xlu0 %555 }
 0x519   :  { %v163_v45 = vadd.f32 %v1903_v6, %v90_v44 }
 0x51b   :  { %v171_v46 = vmax.f32 %v163_v45, 0.0 }
 0x51d   :  { %185 = vadd.xlane.f32.xlu1 %v171_v46  ;;  %v191_v55 = vmul.f32 %v171_v46, %v171_v46 }
 0x5aa   :  { %v186_v56 = vpop.xlane.xlu1 %185 }
 0x5ab   :  { %v203_v58 = vmul.f32 0.0078125, %v186_v56 }
 0x5ad   :  { %v211_v63 = vmul.f32 %v203_v58, %v203_v58 }
 0x5e6   :  { %v598_v48 = vpop.f32.mrb[0].mxu1 }
 0x5e7   :  { %v599_v49 = vadd.f32 %v598_v48, %v556_v47  ;;  %v1598_v50 = vpop.f32.mrb[1].mxu1 }
 0x5e8   :  { %v601_v51 = vpop.f32.mrb[2].mxu1 }
 0x5e9   :  { %v604_v52 = vmax.f32 %v599_v49, 0.0  ;;  %v1599_v53 = vpop.f32.mrb[3].mxu1 }
 0x5eb   :  { %609 = vadd.xlane.f32.xlu0 %v604_v52  ;;  %v611_v54 = vmul.f32 %v604_v52, %v604_v52 }
 0x5ed   :  { %612 = vadd.xlane.f32.xlu1 %v611_v54 }
 0x5ef   :  { %197 = vadd.xlane.f32.xlu0 %v191_v55 }
 0x678   :  { %v610_v57 = vpop.xlane.xlu0 %609 }
 0x679   :  { %v614_v59 = vmul.f32 0.0078125, %v610_v57  ;;  %v176_v57 = vld [vmem:[%s2257_s1 + $0x18] sm:$0xff] }
 0x67a   :  { %v613_v60 = vpop.xlane.xlu1 %612 }
 0x67b   :  { %v616_v6 = vmul.f32 %v614_v59, %v614_v59  ;;  %v615_v61 = vmul.f32 0.0078125, %v613_v60  ;;  %v180_v60 = vld [vmem:[%s2258_s24 + $0x18] sm:$0xff] }
 0x67c   :  { %v198_v62 = vpop.xlane.xlu0 %197 }
 0x67d   :  { %v617_v1 = vsub.f32 %v615_v61, %v616_v6  ;;  %v207_v2 = vmul.f32 0.0078125, %v198_v62  ;;  %v1690_v61 = vld [vmem:[%s2233_s9] sm:$0xff]   ;;  %v1691_v62 = vld [vmem:[%s2233_s9 + $0x8] sm:$0xff]  }
 0x67e   :  { %1582 = vmatprep.mubr.msk.bf16.mxu0 %vm413_vm4, %v1690_v61 }
 0x67f   :  { %v618_v3 = vadd.f32 1e-05, %v617_v1  ;;  %v215_v4 = vsub.f32 %v207_v2, %v211_v63  ;;  %1583 = vmatmul.mubr.msk.bf16.vlgmr.msra.gmra.mrb[8].mxu0 %vm413_vm4, %v1691_v62  ;;  %v1692_v63 = vld [vmem:[%s2233_s9 + $0x30] sm:$0xff]  }
 0x680   :  { %1588 = vmatprep.mubr.msk.bf16.mxu0 %vm413_vm4, %v1692_v63 }
 0x681   :  { %1716 = vrsqrt.f32 %v618_v3  ;;  %v219_v5 = vadd.f32 1e-05, %v215_v4 }
 0x683   :  { %1718 = vrsqrt.f32 %v219_v5 }
 0x68b   :  { %v1717_v8 = vpop.eup %1716 }
 0x68c   :  { %v620_v11 = vmul.f32 %v1717_v8, %v1477_v7 }
 0x68d   :  { %v1719_v12 = vpop.eup %1718 }
 0x68e   :  { %623 = vperm.xlu1 %1686, %v620_v11   ;;  %v227_v13 = vmul.f32 %v1719_v12, %v175_v10  ;;  %v627_v14 = vmul.f32 %v620_v11, %v614_v59 }
 0x690   :  { %241 = vperm.xlu0 %1685, %v227_v13   ;;  %v255_v17 = vmul.f32 %v227_v13, %v203_v58  ;;  %v628_v18 = vsub.f32 %v1478_v15, %v627_v14 }
 0x692   :  { %v259_v19 = vsub.f32 %v179_v16, %v255_v17  ;;  %v1693_v17 = vld [vmem:[%s2233_s9 + $0x38] sm:$0xff]  }
 0x694   :  { %631 = vperm.xlu0 %1685, %v628_v18   ;;  %273 = vperm.xlu1 %1686, %v259_v19   ;;  %v1490_v18 = vld [vmem:[%s2231_s7 + $0x10] sm:$0xff] }
 0x70d   :  { %v624_v20 = vpop.permute.xlu1 %623 }
 0x70e   :  { %v626_v22 = vmul.f32 %v624_v20, %v604_v52 }
 0x70f   :  { %v242_v21 = vpop.permute.xlu0 %241 }
 0x710   :  { %v251_v23 = vmul.f32 %v242_v21, %v171_v46 }
 0x713   :  { %v632_v24 = vpop.permute.xlu0 %631  ;;  %v274_v25 = vpop.permute.xlu1 %273 }
 0x714   :  { %v1991_v26 = vadd.f32 %v632_v24, %v626_v22  ;;  %v283_v28 = vadd.f32 %v274_v25, %v251_v23  ;;  %v1694_v22 = vld [vmem:[%s2233_s9 + $0x10] sm:$0xff]   ;;  %v886_v25 = vld [vmem:[%s2234_s10] sm:$0xff] }
 0x715   :  { %v1491_v23 = vld [vmem:[%s2232_s8 + $0x10] sm:$0xff] }
 0x716   :  { %v713_v29 = vadd.f32 %v1991_v26, %v283_v28  ;;  %v640_v15 = vpack.c.bf16 %v1991_v26, %v1991_v26  ;;  %v888_v28 = vld [vmem:[%s2234_s10 + $0x10] sm:$0xff] }
 0x718   :  { %717 = vrot.lane.b32.xlu0 %v713_v29, %s1776_s25  ;;  %714 = vrot.lane.b32.xlu1 %v713_v29, %s1775_s2  ;;  %v658_v20 = vsel %vm325_vm2, %v640_v15, 0 }
 0x71c   :  { %728 = vperm.xlu0 %1685, %v1488_v30   ;;  %94 = vperm.xlu1 %1686, %v76_v31   ;;  %v1695_v30 = vld [vmem:[%s2233_s9 + $0x18] sm:$0xff]  }
 0x71d   :  { %v889_v31 = vld [vmem:[%s2234_s10 + $0x18] sm:$0xff] }
 0x78a   :  { %v718_v32 = vpop.permute.xlu0 %717  ;;  %v715_v34 = vpop.permute.xlu1 %714 }
 0x78b   :  { %v719_v35 = vmul.f32 %v1936_v36, %v718_v32  ;;  %v716_v37 = vmul.f32 %v1930_v33, %v715_v34  ;;  %v1696_v32 = vld [vmem:[%s2233_s9 + $0x20] sm:$0xff]  }
 0x78d   :  { %v720_v38 = vpack.c.bf16 %v713_v29, %v716_v37  ;;  %v721_v39 = vpack.c.bf16 %v719_v35, %v719_v35  ;;  %v887_v29 = vld [vmem:[%s2234_s10 + $0x8] sm:$0xff] }
 0x78f   :  { %1607 = vmatpush3.bf16.msra.mxu1 %v720_v38  ;;  %v735_v40 = vsel %vm325_vm2, %v721_v39, 0 }
 0x790   :  { %1608 = vmatprep.subr.bf16.mxu1 %v1773_v27 }
 0x793   :  { %1609 = vmatpush3.bf16.msra.mxu1 %v735_v40 }
 0x794   :  { %1620 = vmatprep.subr.bf16.mxu1 %v1888_v0 }
 0x796   :  { %1611 = vmatmul.mubr.msk.bf16.vlgmr.msra.gmra.mrb[4].mxu1 %vm321_vm3, %v1487_v41  ;;  %v1697_v41 = vld [vmem:[%s2233_s9 + $0x28] sm:$0xff]  }
 0x797   :  { %1621 = vmatpush3.bf16.msra.mxu1 %v1888_v0 }
 0x79b   :  { %v95_v36 = vpop.permute.xlu1 %94  ;;  %v729_v27 = vpop.permute.xlu0 %728 }
 0x79c   :  { %v166_v33 = vadd.f32 %v1905_v9, %v95_v36  ;;  %v1698_v36 = vld [vmem:[%s2237_s13] sm:$0xff]  }
 0x79d   :  { %1622 = vmatprep.mubr.msk.bf16.mxu1 %vm113_vm0, %v1698_v36 }
 0x79e   :  { %v172_v42 = vmax.f32 %v166_v33, 0.0  ;;  %v1699_v33 = vld [vmem:[%s2237_s13 + $0x8] sm:$0xff]  }
 0x79f   :  { %1623 = vmatmul.mubr.msk.bf16.vlgmr.msra.gmra.mrb[8].mxu1 %vm113_vm0, %v1699_v33 }
 0x7a0   :  { %187 = vadd.xlane.f32.xlu1 %v172_v42  ;;  %v192_v43 = vmul.f32 %v172_v42, %v172_v42 }
 0x7a2   :  { %199 = vadd.xlane.f32.xlu0 %v192_v43 }
 0x82d   :  { %v188_v44 = vpop.xlane.xlu1 %187 }
 0x82e   :  { %v204_v45 = vmul.f32 0.0078125, %v188_v44 }
 0x82f   :  { %v200_v46 = vpop.xlane.xlu0 %199 }
 0x830   :  { %v212_v47 = vmul.f32 %v204_v45, %v204_v45  ;;  %v208_v48 = vmul.f32 0.0078125, %v200_v46 }
 0x832   :  { %v216_v49 = vsub.f32 %v208_v48, %v212_v47 }
 0x834   :  { %v220_v50 = vadd.f32 1e-05, %v216_v49 }
 0x836   :  { %1720 = vrsqrt.f32 %v220_v50 }
 0x840   :  { %v1721_v56 = vpop.eup %1720 }
 0x841   :  { %v228_v58 = vmul.f32 %v1721_v56, %v176_v57 }
 0x843   :  { %v256_v59 = vmul.f32 %v228_v58, %v204_v45 }
 0x845   :  { %v260_v6 = vsub.f32 %v180_v60, %v256_v59  ;;  %v1700_v59 = vld [vmem:[%s2242_s18] sm:$0xff]   ;;  %v1701_v60 = vld [vmem:[%s2242_s18 + $0x8] sm:$0xff]  }
 0x846   :  { %1626 = vmatprep.subr.bf16.mxu1 %v1700_v59 }
 0x847   :  { %1627 = vmatpush3.bf16.msra.mxu1 %v1700_v59 }
 0x848   :  { %1628 = vmatprep.subr.bf16.mxu1 %v1701_v60 }
 0x84b   :  { %1629 = vmatpush3.bf16.msra.mxu1 %v1701_v60  ;;  %v1706_v60 = vld [vmem:[%s2242_s18 + $0x30] sm:$0xff]  }
 0x869   :  { %v771_v51 = vpop.f32.mrb[4].mxu1 }
 0x86a   :  { %v772_v52 = vadd.f32 %v771_v51, %v729_v27  ;;  %v1612_v53 = vpop.f32.mrb[5].mxu1 }
 0x86b   :  { %v774_v0 = vpop.f32.mrb[6].mxu1 }
 0x86c   :  { %v2013_v54 = vmax.f32 %v772_v52, 0.0  ;;  %v1613_v9 = vpop.f32.mrb[7].mxu1 }
 0x86e   :  { %782 = vadd.xlane.f32.xlu0 %v2013_v54  ;;  %v784_v55 = vmul.f32 %v2013_v54, %v2013_v54 }
 0x870   :  { %785 = vadd.xlane.f32.xlu1 %v784_v55 }
 0x881   :  { %278 = vperm.xlu1 %1686, %v260_v6   ;;  %v1702_v6 = vld [vmem:[%s2242_s18 + $0x10] sm:$0xff]  }
 0x882   :  { %1630 = vmatprep.subr.bf16.mxu1 %v1702_v6 }
 0x883   :  { %1631 = vmatpush3.bf16.msra.mxu1 %v1702_v6 }
 0x884   :  { %246 = vperm.xlu0 %1685, %v228_v58  }
 0x8fb   :  { %v783_v1 = vpop.xlane.xlu0 %782 }
 0x8fc   :  { %v787_v2 = vmul.f32 0.0078125, %v783_v1 }
 0x8fd   :  { %v786_v3 = vpop.xlane.xlu1 %785 }
 0x8fe   :  { %v789_v4 = vmul.f32 %v787_v2, %v787_v2  ;;  %v788_v5 = vmul.f32 0.0078125, %v786_v3 }
 0x900   :  { %v790_v7 = vsub.f32 %v788_v5, %v789_v4 }
 0x901   :  { %v279_v12 = vpop.permute.xlu1 %278 }
 0x902   :  { %v791_v8 = vadd.f32 1e-05, %v790_v7 }
 0x903   :  { %v247_v10 = vpop.permute.xlu0 %246 }
 0x904   :  { %1722 = vrsqrt.f32 %v791_v8  ;;  %v252_v11 = vmul.f32 %v247_v10, %v172_v42 }
 0x906   :  { %v284_v13 = vadd.f32 %v279_v12, %v252_v11 }
 0x908   :  { %v290_v14 = vpack.c.bf16 %v284_v13, %v284_v13 }
 0x90a   :  { %1673 = vmatprep.subr.msk.bf16.mxu0 %vm325_vm2, %v290_v14  ;;  %v489_v16 = vsel %vm325_vm2, %v290_v14, 0 }
 0x90b   :  { %1587 = vmatpush3.bf16.msra.mxu0 %v489_v16 }
 0x90c   :  { %1674 = vmatprep.subr.msk.bf16.mxu0 %vm325_vm2, %v640_v15 }
 0x90e   :  { %v1723_v19 = vpop.eup %1722  ;;  %1589 = vmatmul.mubr.msk.bf16.vlgmr.msra.gmra.mrb[8].mxu0 %vm413_vm4, %v1693_v17 }
 0x90f   :  { %1601 = vmatpush3.bf16.msra.mxu0 %v658_v20  ;;  %v793_v21 = vmul.f32 %v1723_v19, %v1490_v18  ;;  %1602 = vmatprep.mubr.msk.bf16.mxu0 %vm413_vm4, %v1694_v22 }
 0x911   :  { %796 = vperm.xlu1 %1686, %v793_v21   ;;  %v800_v24 = vmul.f32 %v793_v21, %v787_v2 }
 0x913   :  { %v801_v26 = vsub.f32 %v1491_v23, %v800_v24 }
 0x915   :  { %892 = vperm.xlu1 %1686, %v886_v25   ;;  %804 = vperm.xlu0 %1685, %v801_v26  }
 0x919   :  { %902 = vperm.xlu1 %1686, %v888_v28   ;;  %897 = vperm.xlu0 %1685, %v887_v29   ;;  %v918_v29 = vld [vmem:[%s2235_s11] sm:$0xff] }
 0x91a   :  { %1603 = vmatmul.mubr.msk.bf16.vlgmr.msra.gmra.mrb[8].mxu0 %vm413_vm4, %v1695_v30  ;;  %v919_v30 = vld [vmem:[%s2235_s11 + $0x8] sm:$0xff] }
 0x91b   :  { %1616 = vmatprep.mubr.msk.bf16.mxu0 %vm413_vm4, %v1696_v32 }
 0x91d   :  { %907 = vperm.xlu0 %1685, %v889_v31  }
 0x990   :  { %v797_v34 = vpop.permute.xlu1 %796 }
 0x991   :  { %v799_v35 = vmul.f32 %v797_v34, %v2013_v54 }
 0x994   :  { %v805_v37 = vpop.permute.xlu0 %804  ;;  %v893_v42 = vpop.permute.xlu1 %892 }
 0x995   :  { %v807_v38 = vadd.f32 %v805_v37, %v799_v35  ;;  %v920_v35 = vld [vmem:[%s2235_s11 + $0x10] sm:$0xff] }
 0x997   :  { %v813_v39 = vpack.c.bf16 %v807_v38, %v807_v38  ;;  %v921_v38 = vld [vmem:[%s2235_s11 + $0x18] sm:$0xff] }
 0x998   :  { %v898_v43 = vpop.permute.xlu0 %897  ;;  %v903_v27 = vpop.permute.xlu1 %902 }
 0x999   :  { %v831_v40 = vsel %vm325_vm2, %v813_v39, 0  ;;  %1675 = vmatprep.subr.msk.bf16.mxu0 %vm325_vm2, %v813_v39  ;;  %v1703_v39 = vld [vmem:[%s2242_s18 + $0x18] sm:$0xff]  }
 0x99a   :  { %1615 = vmatpush3.bf16.msra.mxu0 %v831_v40  ;;  %1632 = vmatprep.subr.bf16.mxu1 %v1703_v39 }
 0x99b   :  { %1633 = vmatpush3.bf16.msra.mxu1 %v1703_v39 }
 0x99c   :  { %v908_v49 = vpop.permute.xlu0 %907 }
 0x99d   :  { %1617 = vmatmul.mubr.msk.bf16.vlgmr.msra.gmra.mrb[8].mxu0 %vm413_vm4, %v1697_v41 }
 0xa70   :  { %v1618_v44 = vpop.f32.mrb[8].mxu0 }
 0xa71   :  { %v912_v45 = vadd.f32 %v1618_v44, %v903_v27  ;;  %v867_v46 = vpop.f32.mrb[9].mxu0  ;;  %v1704_v27 = vld [vmem:[%s2242_s18 + $0x20] sm:$0xff]  }
 0xa72   :  { %v910_v47 = vadd.f32 %v893_v42, %v867_v46  ;;  %v1619_v48 = vpop.f32.mrb[10].mxu0  ;;  %v922_v46 = vld [vmem:[%s2236_s12] sm:$0xff]  ;;  %1634 = vmatprep.subr.bf16.mxu1 %v1704_v27 }
 0xa73   :  { %v2091_v50 = vmax.f32 %v912_v45, 0.0  ;;  %v870_v51 = vpop.f32.mrb[11].mxu0  ;;  %v913_v53 = vadd.f32 %v1619_v48, %v908_v49  ;;  %v925_v48 = vld [vmem:[%s2236_s12 + $0x18] sm:$0xff]  ;;  %1635 = vmatpush3.bf16.msra.mxu1 %v1704_v27  ;;  %v1624_v49 = vpop.f32.mrb[8].mxu1 }
 0xa74   :  { %v2093_v52 = vmax.f32 %v910_v47, 0.0  ;;  %v911_v0 = vadd.f32 %v898_v43, %v870_v51  ;;  %v923_v43 = vld [vmem:[%s2236_s12 + $0x8] sm:$0xff] }
 0xa75   :  { %930 = vadd.xlane.f32.xlu0 %v2091_v50  ;;  %v2099_v9 = vmax.f32 %v913_v53, 0.0  ;;  %v936_v57 = vmul.f32 %v2091_v50, %v2091_v50  ;;  %v1705_v51 = vld [vmem:[%s2242_s18 + $0x28] sm:$0xff]  }
 0xa76   :  { %v2096_v54 = vmax.f32 %v911_v0, 0.0  ;;  %926 = vadd.xlane.f32.xlu1 %v2093_v52  ;;  %v934_v55 = vmul.f32 %v2093_v52, %v2093_v52  ;;  %1636 = vmatprep.subr.bf16.mxu1 %v1705_v51 }
 0xa77   :  { %v937_v58 = vmul.f32 %v2099_v9, %v2099_v9  ;;  %1637 = vmatpush3.bf16.msra.mxu1 %v1705_v51 }
 0xa78   :  { %v935_v56 = vmul.f32 %v2096_v54, %v2096_v54  ;;  %1638 = vmatprep.subr.bf16.mxu1 %v1706_v60 }
 0xa79   :  { %928 = vadd.xlane.f32.xlu0 %v2096_v54 }
 0xa7a   :  { %932 = vadd.xlane.f32.xlu1 %v2099_v9 }
 0xa7b   :  { %1639 = vmatpush3.bf16.msra.mxu1 %v1706_v60 }
 0xa7d   :  { %938 = vadd.xlane.f32.xlu0 %v934_v55  ;;  %v1084_v55 = vpop.f32.mrb[9].mxu1 }
 0xa7e   :  { %940 = vadd.xlane.f32.xlu1 %v935_v56 }
 0xa81   :  { %942 = vadd.xlane.f32.xlu0 %v936_v57  ;;  %v924_v57 = vld [vmem:[%s2236_s12 + $0x10] sm:$0xff] }
 0xa82   :  { %944 = vadd.xlane.f32.xlu1 %v937_v58  ;;  %v1625_v58 = vpop.f32.mrb[10].mxu1 }
 0xa83   :  { %v1087_v59 = vpop.f32.mrb[11].mxu1 }
 0xb02   :  { %v931_v61 = vpop.xlane.xlu0 %930 }
 0xb03   :  { %v927_v62 = vpop.xlane.xlu1 %926  ;;  %v948_v5 = vmul.f32 0.0078125, %v931_v61  ;;  %v1225_v61 = vld [vmem:[%s2239_s15 + $0x8] sm:$0xff] }
 0xb04   :  { %v946_v1 = vmul.f32 0.0078125, %v927_v62  ;;  %v1224_v62 = vld [vmem:[%s2239_s15] sm:$0xff] }
 0xb05   :  { %v956_v17 = vmul.f32 %v948_v5, %v948_v5 }
 0xb06   :  { %v929_v63 = vpop.xlane.xlu0 %928  ;;  %v954_v7 = vmul.f32 %v946_v1, %v946_v1 }
 0xb07   :  { %v933_v2 = vpop.xlane.xlu1 %932  ;;  %v947_v3 = vmul.f32 0.0078125, %v929_v63  ;;  %v1707_v63 = vld [vmem:[%s2242_s18 + $0x38] sm:$0xff]  }
 0xb08   :  { %v949_v12 = vmul.f32 0.0078125, %v933_v2  ;;  %1640 = vmatprep.subr.bf16.mxu1 %v1707_v63  ;;  %v1226_v2 = vld [vmem:[%s2239_s15 + $0x10] sm:$0xff] }
 0xb09   :  { %v955_v11 = vmul.f32 %v947_v3, %v947_v3  ;;  %1641 = vmatpush3.bf16.msra.mxu1 %v1707_v63 }
 0xb0a   :  { %v939_v4 = vpop.xlane.xlu0 %938  ;;  %v957_v21 = vmul.f32 %v949_v12, %v949_v12 }
 0xb0b   :  { %v950_v8 = vmul.f32 0.0078125, %v939_v4  ;;  %v941_v10 = vpop.xlane.xlu1 %940  ;;  %v1401_v4 = vld [vmem:[%s2240_s16] sm:$0xff] }
 0xb0c   :  { %v951_v13 = vmul.f32 0.0078125, %v941_v10 }
 0xb0d   :  { %v958_v14 = vsub.f32 %v950_v8, %v954_v7  ;;  %v1403_v7 = vld [vmem:[%s2240_s16 + $0x10] sm:$0xff] }
 0xb0e   :  { %v959_v15 = vsub.f32 %v951_v13, %v955_v11  ;;  %v943_v16 = vpop.xlane.xlu0 %942 }
 0xb0f   :  { %v962_v18 = vadd.f32 1e-05, %v958_v14  ;;  %v952_v19 = vmul.f32 0.0078125, %v943_v16  ;;  %v945_v20 = vpop.xlane.xlu1 %944 }
 0xb10   :  { %v963_v22 = vadd.f32 1e-05, %v959_v15  ;;  %v953_v23 = vmul.f32 0.0078125, %v945_v20 }
 0xb11   :  { %1724 = vrsqrt.f32 %v962_v18  ;;  %v960_v24 = vsub.f32 %v952_v19, %v956_v17 }
 0xb12   :  { %1726 = vrsqrt.f32 %v963_v22  ;;  %v961_v25 = vsub.f32 %v953_v23, %v957_v21 }
 0xb13   :  { %v964_v26 = vadd.f32 1e-05, %v960_v24 }
 0xb14   :  { %v965_v28 = vadd.f32 1e-05, %v961_v25 }
 0xb15   :  { %1728 = vrsqrt.f32 %v964_v26 }
 0xb16   :  { %1730 = vrsqrt.f32 %v965_v28 }
 0xb1b   :  { %v1725_v31 = vpop.eup %1724 }
 0xb1c   :  { %v1727_v32 = vpop.eup %1726  ;;  %v970_v34 = vmul.f32 %v1725_v31, %v918_v29 }
 0xb1d   :  { %v971_v37 = vmul.f32 %v1727_v32, %v919_v30 }
 0xb1e   :  { %976 = vperm.xlu0 %1685, %v970_v34   ;;  %v998_v44 = vmul.f32 %v970_v34, %v946_v1  ;;  %v1227_v1 = vld [vmem:[%s2239_s15 + $0x18] sm:$0xff] }
 0xb1f   :  { %v1729_v40 = vpop.eup %1728  ;;  %v999_v42 = vmul.f32 %v971_v37, %v947_v3  ;;  %v1402_v3 = vld [vmem:[%s2240_s16 + $0x8] sm:$0xff] }
 0xb20   :  { %v1731_v41 = vpop.eup %1730  ;;  %v972_v36 = vmul.f32 %v1729_v40, %v920_v35  ;;  %v1002_v53 = vsub.f32 %v922_v46, %v998_v44 }
 0xb21   :  { %v973_v33 = vmul.f32 %v1731_v41, %v921_v38  ;;  %v1003_v45 = vsub.f32 %v923_v43, %v999_v42  ;;  %v1340_v38 = vld [vmem:[%s2243_s19] sm:$0x1] }
 0xb22   :  { %986 = vperm.xlu1 %1686, %v972_v36   ;;  %v1000_v0 = vmul.f32 %v972_v36, %v948_v5  ;;  %v1404_v5 = vld [vmem:[%s2240_s16 + $0x18] sm:$0xff]  ;;  %v1350_v39 = vsel %vm1348_vm6, %v1340_v38, 0 }
 0xb23   :  { %991 = vperm.xlu0 %1685, %v973_v33   ;;  %v1001_v47 = vmul.f32 %v973_v33, %v949_v12 }
 0xb24   :  { %v1004_v6 = vsub.f32 %v924_v57, %v1000_v0 }
 0xb25   :  { %v1005_v56 = vsub.f32 %v925_v48, %v1001_v47 }
 0xb26   :  { %981 = vperm.xlu1 %1686, %v971_v37   ;;  %v1709_v37 = vld [vmem:[%s2238_s14 + $0x8] sm:$0xff]  }
 0xb27   :  { %1013 = vperm.xlu0 %1685, %v1003_v45  }
 0xb2a   :  { %1008 = vperm.xlu1 %1686, %v1002_v53  }
 0xb2b   :  { %1023 = vperm.xlu0 %1685, %v1005_v56  }
 0xb2e   :  { %1018 = vperm.xlu1 %1686, %v1004_v6  }
 0xb2f   :  { %1235 = vperm.xlu0 %1685, %v1225_v61  }
 0xb32   :  { %1230 = vperm.xlu1 %1686, %v1224_v62  }
 0xb33   :  { %1245 = vperm.xlu0 %1685, %v1227_v1  }
 0xb36   :  { %1240 = vperm.xlu1 %1686, %v1226_v2  }
 0xb37   :  { %1412 = vperm.xlu0 %1685, %v1402_v3  }
 0xb3a   :  { %1407 = vperm.xlu1 %1686, %v1401_v4  }
 0xb3b   :  { %1422 = vperm.xlu0 %1685, %v1404_v5  }
 0xb3e   :  { %1417 = vperm.xlu1 %1686, %v1403_v7  }
 0xb9d   :  { %v977_v8 = vpop.permute.xlu0 %976 }
 0xb9e   :  { %v994_v15 = vmul.f32 %v977_v8, %v2093_v52 }
 0xba1   :  { %v987_v10 = vpop.permute.xlu1 %986 }
 0xba2   :  { %v992_v11 = vpop.permute.xlu0 %991  ;;  %v996_v21 = vmul.f32 %v987_v10, %v2091_v50  ;;  %v1708_v50 = vld [vmem:[%s2238_s14] sm:$0xff]   ;;  %s1777_s14 = smov [#allocation2]  }
 0xba3   :  { %v997_v18 = vmul.f32 %v992_v11, %v2099_v9  ;;  %1650 = vmatprep.mubr.msk.bf16.mxu0 %vm1258_vm5, %v1708_v50  ;;  %s1442_s19 = sshll.u32 %s1777_s14, 4  ;;  %s1443_s19 = int_to_ptr.vmem [resolvable:$true] %s1442_s19 }
 0xba4   :  { %s1748_s3 = scalar_lea.vmem %s1443_s19, 512  ;;  %p1753_p1 = scmp.lt.s32.totalorder %s1443_s19, %s1443_s19 }
 0xba5   :  { %v982_v12 = vpop.permute.xlu1 %981  ;;  %p1749_p0 = scmp.ne.s32.totalorder %s1443_s19, %s1748_s3  ;;  %p1754_p2 = scmp.lt.s32.totalorder %s1748_s3, %s1748_s3 }
 0xba6   :  { %v995_v13 = vmul.f32 %v982_v12, %v2096_v54  ;;  %v1014_v14 = vpop.permute.xlu0 %1013 }
 0xba7   :  { %p1755_p3 = por %p1754_p2, %p1753_p1 }
 0xba8   :  { %v1027_v16 = vadd.f32 %v1014_v14, %v995_v13 }
 0xba9   :  { %v1009_v17 = vpop.permute.xlu1 %1008  ;;  %p1756_p4 = pnand %p1755_p3, %p1749_p0 }
 0xbaa   :  { %v1026_v19 = vadd.f32 %v1009_v17, %v994_v15  ;;  %v1024_v20 = vpop.permute.xlu0 %1023  ;;  %v2187_v22 = vadd.f32 %v1087_v59, %v1027_v16 }
 0xbab   :  { %v1029_v24 = vadd.f32 %v1024_v20, %v997_v18 }
 0xbac   :  { %v2189_v23 = vadd.f32 %v1084_v55, %v1026_v19 }
 0xbad   :  { %v1019_v25 = vpop.permute.xlu1 %1018  ;;  %v2193_v28 = vadd.f32 %v1625_v58, %v1029_v24 }
 0xbae   :  { %v1028_v26 = vadd.f32 %v1019_v25, %v996_v21  ;;  %v1103_v54 = vpack.c.bf16 %v2187_v22, %v2189_v23  ;;  %v1236_v41 = vpop.permute.xlu0 %1235 }
 0xbb0   :  { %v2195_v52 = vadd.f32 %v1624_v49, %v1028_v26  ;;  %1642 = vmatprep.mubr.bf16.mxu1 %v1103_v54 }
 0xbb1   :  { %v1231_v40 = vpop.permute.xlu1 %1230 }
 0xbb2   :  { %v1104_v9 = vpack.c.bf16 %v2193_v28, %v2195_v52  ;;  %v1246_v27 = vpop.permute.xlu0 %1245 }
 0xbb4   :  { %1643 = vmatmul.mubr.bf16.vlgmr.msra.gmra.mrb[12].mxu1 %v1104_v9 }
 0xbb5   :  { %v1241_v36 = vpop.permute.xlu1 %1240 }
 0xbb6   :  { %v1413_v7 = vpop.permute.xlu0 %1412 }
 0xbb7   :  { %v1426_v17 = vadd.f32 %v1413_v7, %v2187_v22 }
 0xbb9   :  { %v1408_v5 = vpop.permute.xlu1 %1407 }
 0xbba   :  { %v1423_v10 = vpop.permute.xlu0 %1422  ;;  %v1425_v12 = vadd.f32 %v1408_v5, %v2189_v23 }
 0xbbb   :  { %v1428_v14 = vadd.f32 %v1423_v10, %v2193_v28 }
 0xbbd   :  { %v1418_v8 = vpop.permute.xlu1 %1417 }
 0xbbe   :  { %v1427_v11 = vadd.f32 %v1418_v8, %v2195_v52 }
 0xc87   :  { %v1644_v29 = vpop.f32.mrb[12].mxu1 }
 0xc88   :  { %v1203_v30 = vpop.f32.mrb[13].mxu1 }
 0xc89   :  { %v1645_v31 = vpop.f32.mrb[14].mxu1 }
 0xc8a   :  { %v1223_v32 = vpack.c.bf16 %v1645_v31, %v1644_v29  ;;  %v1206_v34 = vpop.f32.mrb[15].mxu1 }
 0xc8b   :  { %v1222_v35 = vpack.c.bf16 %v1206_v34, %v1203_v30 }
 0xc8d   :  { %1646 = vmatprep.subr.bf16.mxu0 %v1222_v35 }
 0xc8e   :  { %1647 = vmatpush3.bf16.msra.mxu0 %v1222_v35 }
 0xc8f   :  { %1648 = vmatprep.subr.bf16.mxu0 %v1223_v32 }
 0xc92   :  { %1649 = vmatpush3.bf16.msra.mxu0 %v1223_v32 }
 0xc93   :  { %1676 = vmatprep.subr.msk.bf16.mxu0 %vm1348_vm6, %v1340_v38 }
 0xc95   :  { %1651 = vmatmul.mubr.msk.bf16.vlgmr.msra.gmra.mrb[12].mxu0 %vm1258_vm5, %v1709_v37 }
 0xc96   :  { %1655 = vmatpush3.bf16.msra.mxu0 %v1350_v39 }
 0xd68   :  { %v1652_v33 = vpop.f32.mrb[12].mxu0 }
 0xd69   :  { %v1308_v42 = vadd.f32 %v1652_v33, %v1241_v36  ;;  %v1299_v43 = vpop.f32.mrb[13].mxu0 }
 0xd6a   :  { %v1300_v44 = vadd.f32 %v1299_v43, %v1231_v40  ;;  %v1653_v45 = vpop.f32.mrb[14].mxu0 }
 0xd6b   :  { %v1518_v46 = vmul.f32 -1.442695, %v1308_v42  ;;  %v1311_v47 = vadd.f32 %v1653_v45, %v1246_v27  ;;  %v1302_v48 = vpop.f32.mrb[15].mxu0 }
 0xd6c   :  { %v1516_v49 = vmul.f32 -1.442695, %v1300_v44  ;;  %v1303_v51 = vadd.f32 %v1302_v48, %v1236_v41 }
 0xd6d   :  { %1732 = vpow2.f32 %v1518_v46  ;;  %v1519_v53 = vmul.f32 -1.442695, %v1311_v47 }
 0xd6e   :  { %1734 = vpow2.f32 %v1516_v49  ;;  %v1517_v0 = vmul.f32 -1.442695, %v1303_v51 }
 0xd6f   :  { %1736 = vpow2.f32 %v1519_v53 }
 0xd70   :  { %1738 = vpow2.f32 %v1517_v0 }
 0xd77   :  { %v1733_v55 = vpop.eup %1732 }
 0xd78   :  { %v1735_v56 = vpop.eup %1734  ;;  %v1328_v57 = vadd.f32 1.0, %v1733_v55 }
 0xd79   :  { %v1737_v58 = vpop.eup %1736  ;;  %v1326_v59 = vadd.f32 1.0, %v1735_v56 }
 0xd7a   :  { %v1739_v60 = vpop.eup %1738  ;;  %1740 = vrcp.f32 %v1328_v57  ;;  %v1329_v6 = vadd.f32 1.0, %v1737_v58 }
 0xd7b   :  { %1742 = vrcp.f32 %v1326_v59  ;;  %v1327_v61 = vadd.f32 1.0, %v1739_v60 }
 0xd7c   :  { %1744 = vrcp.f32 %v1329_v6 }
 0xd7d   :  { %1746 = vrcp.f32 %v1327_v61 }
 0xd84   :  { %v1741_v62 = vpop.eup %1740 }
 0xd85   :  { %v1743_v63 = vpop.eup %1742 }
 0xd86   :  { %v1745_v1 = vpop.eup %1744 }
 0xd87   :  { %v1747_v2 = vpop.eup %1746  ;;  %v1339_v3 = vpack.c.bf16 %v1745_v1, %v1741_v62 }
 0xd88   :  { %v1338_v4 = vpack.c.bf16 %v1747_v2, %v1743_v63 }
 0xd8a   :  { %1656 = vmatprep.mubr.msk.bf16.mxu0 %vm1341_vm7, %v1338_v4 }
 0xd8b   :  { %1657 = vmatmul.mubr.msk.bf16.vlgmr.msra.gmra.mrb[16].mxu0 %vm1341_vm7, %v1339_v3 }
 0xe5e   :  { %v1658_v13 = vpop.f32.mrb[16].mxu0 }
 0xe5f   :  { %v1431_v15 = vmul.f32 %v1658_v13, %v1427_v11  ;;  %v1386_v16 = vpop.f32.mrb[17].mxu0 }
 0xe60   :  { %v1429_v18 = vmul.f32 %v1425_v12, %v1386_v16  ;;  %v1659_v19 = vpop.f32.mrb[18].mxu0 }
 0xe61   :  { %1435 = vst [vmem:[#allocation2 + $0x10] sm:$0xff] %v1431_v15  ;;  %v1432_v20 = vmul.f32 %v1659_v19, %v1428_v14  ;;  %v1389_v21 = vpop.f32.mrb[19].mxu0 }
 0xe62   :  { %1433 = vst [vmem:[#allocation2] sm:$0xff] %v1429_v18  ;;  %v1430_v24 = vmul.f32 %v1426_v17, %v1389_v21 }
 0xe63   :  { %1436 = vst [vmem:[#allocation2 + $0x18] sm:$0xff] %v1432_v20 }
 0xe64   :  { %1434 = vst [vmem:[#allocation2 + $0x8] sm:$0xff] %v1430_v24 }
 0xe65   :  { %1759 = shalt.err (!%p1756_p4)
}
 0xe66   :  { %s1760_s7 = scalar_lea.hbm %s2244_s20, 512 }
 0xe67   :  { %p1761_p5 = scmp.ne.s32.totalorder %s2244_s20, %s1760_s7  ;;  %p1764_p6 = scmp.lt.u32.totalorder %s1760_s7, %s2244_s20 }
 0xe69   :  { %p1766_p7 = pnand %p1764_p6, %p1761_p5 }
 0xe6b   :  { %1769 = shalt.err (!%p1766_p7)
}
 0xe6c   :  { %s1778_s26 = smov 128   ;;  %s1779_s27 = smov 8  }
 0xe6d   :  { %1448 = dma.vmem_to_hbm [thread:$0]  %s1443_s19, 512, %s2244_s20, [#allocation3], %s1778_s26, %s1778_s26, %s1779_s27  }
 0xe6e   :  { %1770 = dma.done.wait [#allocation3], 512  }
 0xe6f   :  { %1771 = vsyncadd [#allocation3], 4294966784 }
 0xe70   :  { %1452 = vsyncpa [#allocation3], 1 }

</bundles_post_ra>
